<compile_context>
chip_gen: v7x
topology: tpu7x:2x2x1
jax: 0.10.0
libtpu: 0.0.40
codegen_flags: <defaults>
</compile_context>

<pallas_src>
import functools

import jax
import jax.numpy as jnp
from jax import lax
from jax.experimental import pallas as pl
from jax.experimental.pallas import tpu as pltpu

_DN_COLS = (((0,), (0,)), ((), ()))  # contract the sequence axis of (block_t, *) operands


# --------------------------------------------------------------------------------------
# shared in-kernel helpers
# --------------------------------------------------------------------------------------
def _row_losses(acc_ref, dsum_ref, prev_ref, p_ref, t32, s32, nt2, ns2,
                ratio, k, block_t, mm_dtype):
    """Content / cosine / local / global / temporal partial sums for one (block_t, D) tile."""
    dots = jnp.sum(t32 * s32, axis=-1, keepdims=True)

    # content: sum of row L2 norms of (t - ratio * s)
    cdiff = t32 - ratio * s32
    acc_ref[0] += jnp.sum(jnp.sqrt(jnp.sum(cdiff * cdiff, axis=-1, keepdims=True)))

    # cosine: sum of (1 - cos)
    denom = jnp.maximum(jnp.sqrt(nt2) * jnp.sqrt(ns2), 1e-8)
    acc_ref[1] += jnp.sum(1.0 - dots / denom)

    # local + global share d = t - s (difference formed in f32 before the MXU cast)
    d32 = t32 - s32
    loc = jnp.dot(d32.astype(mm_dtype), p_ref[...], preferred_element_type=jnp.float32)
    acc_ref[2] += jnp.sum(loc * loc)
    dsum_ref[...] += jnp.sum(d32, axis=0, keepdims=True)

    # temporal: in-tile first differences + carried boundary row from the previous tile
    w = (k > 0).astype(jnp.float32)
    bt = t32[0:1, :] - prev_ref[0]
    bs = s32[0:1, :] - prev_ref[1]
    tdot = w * jnp.sum(bt * bs)
    tnt = w * jnp.sum(bt * bt)
    tns = w * jnp.sum(bs * bs)
    if block_t > 1:
        dt_in = t32[1:, :] - t32[:-1, :]
        ds_in = s32[1:, :] - s32[:-1, :]
        tdot += jnp.sum(dt_in * ds_in)
        tnt += jnp.sum(dt_in * dt_in)
        tns += jnp.sum(ds_in * ds_in)
    acc_ref[3] += tdot
    acc_ref[4] += tnt
    acc_ref[5] += tns
    prev_ref[0] = t32[block_t - 1:block_t, :]
    prev_ref[1] = s32[block_t - 1:block_t, :]


def _emit_components(out_ref, comps):
    """Write the 7 per-sample scalar partials into a lane-dense (1,1,128) output block."""
    lane = lax.broadcasted_iota(jnp.int32, (1, 1, 128), 2)
    vec = jnp.zeros((1, 1, 128), jnp.float32)
    for i, c in enumerate(comps):
        vec = jnp.where(lane == i, c, vec)
    out_ref[...] = vec


# --------------------------------------------------------------------------------------
# full-D accumulator kernel (common path: 4*D^2*4B fits the VMEM budget)
# --------------------------------------------------------------------------------------
def _loss_kernel_full(ratio_ref, t_ref, s_ref, p_ref, out_ref,
                      acc_ref, dsum_ref, ga_ref, gb_ref, gm_ref, sp_ref, prev_ref,
                      *, T, block_t, mm_dtype):
    b = pl.program_id(0)
    k = pl.program_id(1)
    n_k = pl.num_programs(1)

    @pl.when(k == 0)
    def _init():
        for i in range(8):
            acc_ref[i] = 0.0
        dsum_ref[...] = jnp.zeros_like(dsum_ref)
        ga_ref[...] = jnp.zeros_like(ga_ref)
        gb_ref[...] = jnp.zeros_like(gb_ref)
        gm_ref[...] = jnp.zeros_like(gm_ref)
        sp_ref[...] = jnp.zeros_like(sp_ref)
        prev_ref[...] = jnp.zeros_like(prev_ref)

    t32 = t_ref[0].astype(jnp.float32)            # (block_t, D) f32 for VPU work
    s32 = s_ref[0].astype(jnp.float32)
    ratio = ratio_ref[b]                          # precomputed per-sample scale ratio

    nt2 = jnp.sum(t32 * t32, axis=-1, keepdims=True)
    ns2 = jnp.sum(s32 * s32, axis=-1, keepdims=True)

    _row_losses(acc_ref, dsum_ref, prev_ref, p_ref, t32, s32, nt2, ns2,
                ratio, k, block_t, mm_dtype)

    # context: Grams of A = tn+sn, B = tn-sn of the L2-normalized rows (3 MXU matmuls)
    tn = t32 * lax.rsqrt(jnp.maximum(nt2, 1e-24))
    sn = s32 * lax.rsqrt(jnp.maximum(ns2, 1e-24))
    an = (tn + sn).astype(mm_dtype)
    bn = (tn - sn).astype(mm_dtype)
    ga_ref[...] += lax.dot_general(an, an, _DN_COLS, preferred_element_type=jnp.float32)
    gb_ref[...] += lax.dot_general(bn, bn, _DN_COLS, preferred_element_type=jnp.float32)
    gm_ref[...] += lax.dot_general(an, bn, _DN_COLS, preferred_element_type=jnp.float32)

    # spectral: single Gram  M += (t+s)^T (t-s);   t^T t - s^T s = 0.5*(M + M^T)
    ap = (t32 + s32).astype(mm_dtype)
    bm = (t32 - s32).astype(mm_dtype)
    sp_ref[...] += lax.dot_general(ap, bm, _DN_COLS, preferred_element_type=jnp.float32)

    @pl.when(k == n_k - 1)
    def _finalize():
        ga = ga_ref[...]
        gb = gb_ref[...]
        m = gm_ref[...]
        # ||Tn Tn^T - Sn Sn^T||_F^2 = 0.5 * (<Ga, Gb> + tr(M^2))
        ctx_sq = 0.5 * (jnp.sum(ga * gb) + jnp.sum(m * m.T))
        context_fro = jnp.sqrt(jnp.maximum(ctx_sq, 0.0))
        msp = sp_ref[...]
        spectral_fro = 0.5 * jnp.sqrt(jnp.sum((msp + msp.T) ** 2)) * (1.0 / T)
        global_sq = jnp.sum((dsum_ref[...] * (1.0 / T)) ** 2)
        temporal = 1.0 - acc_ref[3] / jnp.maximum(jnp.sqrt(acc_ref[4] * acc_ref[5]), 1e-8)
        _emit_components(out_ref, (acc_ref[0], acc_ref[1], context_fro, acc_ref[2],
                                   global_sq, temporal, spectral_fro))


# --------------------------------------------------------------------------------------
# D-column-tiled accumulator kernel (large D, e.g. D>=1536 on v7x): grid = (B, j, k)
# --------------------------------------------------------------------------------------
def _loss_kernel_dtiled(ratio_ref, t_ref, s_ref, tcol_ref, scol_ref, p_ref, out_ref,
                        acc_ref, dsum_ref, gp_ref, gq_ref, gr_ref, sp_ref, prev_ref,
                        *, T, block_t, mm_dtype):
    b = pl.program_id(0)
    j = pl.program_id(1)
    k = pl.program_id(2)
    n_j = pl.num_programs(1)
    n_k = pl.num_programs(2)

    @pl.when(jnp.logical_and(j == 0, k == 0))
    def _init_sample():
        for i in range(8):
            acc_ref[i] = 0.0
        dsum_ref[...] = jnp.zeros_like(dsum_ref)
        prev_ref[...] = jnp.zeros_like(prev_ref)

    @pl.when(k == 0)
    def _init_col():
        gp_ref[...] = jnp.zeros_like(gp_ref)
        gq_ref[...] = jnp.zeros_like(gq_ref)
        gr_ref[...] = jnp.zeros_like(gr_ref)
        sp_ref[...] = jnp.zeros_like(sp_ref)

    t32 = t_ref[0].astype(jnp.float32)            # full (block_t, D) rows
    s32 = s_ref[0].astype(jnp.float32)
    tc32 = tcol_ref[0].astype(jnp.float32)        # (block_t, block_d) column view
    sc32 = scol_ref[0].astype(jnp.float32)
    ratio = ratio_ref[b]

    nt2 = jnp.sum(t32 * t32, axis=-1, keepdims=True)
    ns2 = jnp.sum(s32 * s32, axis=-1, keepdims=True)

    # scalar (row-wise) losses only on the first column sweep
    @pl.when(j == 0)
    def _scalars():
        _row_losses(acc_ref, dsum_ref, prev_ref, p_ref, t32, s32, nt2, ns2,
                    ratio, k, block_t, mm_dtype)

    # context: column blocks of P = Tn^T Tn, Q = Sn^T Sn, R = Tn^T Sn (Frobenius sums are
    # column-local, so the per-j partial folds into SMEM; cancellation caveat as original).
    rt = lax.rsqrt(jnp.maximum(nt2, 1e-24))
    rs = lax.rsqrt(jnp.maximum(ns2, 1e-24))
    tn = (t32 * rt).astype(mm_dtype)
    sn = (s32 * rs).astype(mm_dtype)
    tnc = (tc32 * rt).astype(mm_dtype)
    snc = (sc32 * rs).astype(mm_dtype)
    gp_ref[...] += lax.dot_general(tn, tnc, _DN_COLS, preferred_element_type=jnp.float32)
    gq_ref[...] += lax.dot_general(sn, snc, _DN_COLS, preferred_element_type=jnp.float32)
    gr_ref[...] += lax.dot_general(tn, snc, _DN_COLS, preferred_element_type=jnp.float32)

    # spectral column block of t^T t - s^T s = A'^T B + B^T A'  with A' = 0.5*(t+s), B = t-s
    # (difference formed in f32 before the cast; no cancellation of large terms)
    ah = (0.5 * (t32 + s32)).astype(mm_dtype)
    bf = (t32 - s32).astype(mm_dtype)
    ahc = (0.5 * (tc32 + sc32)).astype(mm_dtype)
    bfc = (tc32 - sc32).astype(mm_dtype)
    sp_ref[...] += lax.dot_general(ah, bfc, _DN_COLS, preferred_element_type=jnp.float32)
    sp_ref[...] += lax.dot_general(bf, ahc, _DN_COLS, preferred_element_type=jnp.float32)

    @pl.when(k == n_k - 1)
    def _fold_col():
        acc_ref[6] += (jnp.sum(gp_ref[...] ** 2) + jnp.sum(gq_ref[...] ** 2)
                       - 2.0 * jnp.sum(gr_ref[...] ** 2))
        acc_ref[7] += jnp.sum(sp_ref[...] ** 2)

    @pl.when(jnp.logical_and(j == n_j - 1, k == n_k - 1))
    def _finalize():
        context_fro = jnp.sqrt(jnp.maximum(acc_ref[6], 0.0))
        spectral_fro = jnp.sqrt(jnp.maximum(acc_ref[7], 0.0)) * (1.0 / T)
        global_sq = jnp.sum((dsum_ref[...] * (1.0 / T)) ** 2)
        temporal = 1.0 - acc_ref[3] / jnp.maximum(jnp.sqrt(acc_ref[4] * acc_ref[5]), 1e-8)
        _emit_components(out_ref, (acc_ref[0], acc_ref[1], context_fro, acc_ref[2],
                                   global_sq, temporal, spectral_fro))


# --------------------------------------------------------------------------------------
# planning helpers (VMEM budget -> mode / block_t / block_d / vmem_limit_bytes)
# --------------------------------------------------------------------------------------
def _default_vmem_budget():
    # Safe on v7x (64 MiB physical per TensorCore); uses the hardware query when available
    # so v5e/v6e (128 MiB physical) get a larger budget.
    try:
        cap = int(pltpu.get_tpu_info().vmem_capacity_bytes)
        return max(32 << 20, int(cap * 0.7))
    except Exception:
        return 48 << 20


def _largest_divisor_leq(n, cap, multiple_of=1):
    best = None
    d = 1
    while d * d <= n:
        if n % d == 0:
            for c in (d, n // d):
                if c <= cap and (c % multiple_of == 0 or c == n):
                    if best is None or c > best:
                        best = c
        d += 1
    return best


def _plan(T, D, itemsize, budget, block_t, block_d):
    acc_full = 4 * D * D * 4
    acc_budget = max(4 << 20, int(budget * 0.45))
    if block_d is not None:
        tiled = block_d < D
        assert D % block_d == 0 and (block_d % 128 == 0 or block_d == D), \
            "block_d must divide D and be a multiple of 128"
    else:
        tiled = (acc_full > acc_budget) and (D % 128 == 0)
        if tiled:
            bd_cap = max(128, ((acc_budget // (16 * D)) // 128) * 128)
            block_d = _largest_divisor_leq(D, min(bd_cap, D), 128) or 128
        else:
            block_d = D
            # TODO(synk): D too large for full-mode accumulators and not a multiple of 128
            #             (no lane-aligned column tiling available) is not handled.
    acc_bytes = (4 * D * block_d * 4) if tiled else acc_full
    # per-row VMEM: 2 inputs x 2 pipeline buffers (+ column views when tiled) + ~8 f32 temps
    per_row = 4 * D * itemsize + (4 * block_d * itemsize if tiled else 0) + 8 * D * 4
    if block_t is None:
        avail = max(budget - acc_bytes - (2 << 20), 8 * per_row)
        cap_rows = max(8, avail // per_row)
        min_rows = 16 if itemsize < 4 else 8
        block_t = (_largest_divisor_leq(T, min(T, cap_rows), min_rows)
                   or _largest_divisor_leq(T, min(T, cap_rows), 1)
                   or T)
    else:
        assert T % block_t == 0, "block_t must divide T"
    footprint = acc_bytes + block_t * per_row + (4 << 20)
    if footprint > budget + (16 << 20):
        raise ValueError(
            f"AttentionWrapper loss kernel does not fit VMEM: D={D}, T={T}, "
            f"block_t={block_t}, block_d={block_d}, ~{footprint >> 20} MiB needed. "
            "Pad/shard T or pass a smaller block_t/block_d.")
    return tiled, block_t, block_d, footprint


# --------------------------------------------------------------------------------------
# wrapper (forward semantics: returns (teacher_hidden_states, special_attn_loss))
# --------------------------------------------------------------------------------------
def attention_wrapper_forward(teacher_hidden_states, student_hidden_states, *,
                              layer_idx=3, n_layer=32,
                              local_weight=0.5, global_weight=0.5,
                              temporal_weight=1.0, spectral_weight=0.3,
                              matmul_dtype=None, block_t=None, block_d=None,
                              vmem_budget_bytes=None):
    B, T, D = teacher_hidden_states.shape
    chunk_size = max(1, D // 16)
    num_chunks = D // chunk_size
    itemsize = jnp.dtype(teacher_hidden_states.dtype).itemsize
    # MXU operands default to bf16 even for f32 inputs (f32 matmul is multi-pass / slow);
    # all accumulation and VPU reductions stay f32.
    mm_dtype = jnp.bfloat16 if matmul_dtype is None else matmul_dtype

    budget = _default_vmem_budget() if vmem_budget_bytes is None else int(vmem_budget_bytes)
    tiled, block_t, block_d, footprint = _plan(T, D, itemsize, budget, block_t, block_d)
    n_k = T // block_t

    # per-sample scale ratio: cheap XLA reduce; lands in SMEM via scalar prefetch
    tf = teacher_hidden_states.astype(jnp.float32)
    sf = student_hidden_states.astype(jnp.float32)
    ratio = (jnp.mean(jnp.abs(tf), axis=(1, 2)) /
             (jnp.mean(jnp.abs(sf), axis=(1, 2)) + 1e-8)).astype(jnp.float32)     # (B,)

    # projection realizing view(B,T,num_chunks,chunk_size).mean(-2) as one matmul;
    # zero-padded to a lane-dense (>=128) column count (padding keeps sum(loc^2) exact).
    p_cols = chunk_size if chunk_size % 128 == 0 else ((chunk_size + 127) // 128) * 128
    col = jnp.arange(D) % chunk_size
    P = (jax.nn.one_hot(col, p_cols, dtype=jnp.float32) / num_chunks).astype(mm_dtype)

    vmem_limit = int(min(max(footprint + (8 << 20), 32 << 20), budget + (8 << 20)))
    out_shape = jax.ShapeDtypeStruct((B, 1, 128), jnp.float32)

    if not tiled:
        kernel = functools.partial(_loss_kernel_full, T=T, block_t=block_t, mm_dtype=mm_dtype)
        comps = pl.pallas_call(
            kernel,
            out_shape=out_shape,
            grid_spec=pltpu.PrefetchScalarGridSpec(
                num_scalar_prefetch=1,                       # ratio (B,) lands in SMEM
                grid=(B, n_k),
                in_specs=[pl.BlockSpec((1, block_t, D), lambda b, k, r: (b, k, 0)),
                          pl.BlockSpec((1, block_t, D), lambda b, k, r: (b, k, 0)),
                          pl.BlockSpec((D, p_cols), lambda b, k, r: (0, 0))],
                out_specs=pl.BlockSpec((1, 1, 128), lambda b, k, r: (b, 0, 0)),
                scratch_shapes=[pltpu.SMEM((8,), jnp.float32),        # scalar accumulators
                                pltpu.VMEM((1, D), jnp.float32),      # sum of (t - s) rows
                                pltpu.VMEM((D, D), jnp.float32),      # Ga = A^T A
                                pltpu.VMEM((D, D), jnp.float32),      # Gb = B^T B
                                pltpu.VMEM((D, D), jnp.float32),      # M  = A^T B
                                pltpu.VMEM((D, D), jnp.float32),      # M_sp = (t+s)^T(t-s)
                                pltpu.VMEM((2, 1, D), jnp.float32)]), # temporal boundary rows
            compiler_params=pltpu.CompilerParams(
                dimension_semantics=("parallel", "arbitrary"),
                vmem_limit_bytes=vmem_limit),
        )(ratio, teacher_hidden_states, student_hidden_states, P)
    else:
        n_j = D // block_d
        kernel = functools.partial(_loss_kernel_dtiled, T=T, block_t=block_t, mm_dtype=mm_dtype)
        comps = pl.pallas_call(
            kernel,
            out_shape=out_shape,
            grid_spec=pltpu.PrefetchScalarGridSpec(
                num_scalar_prefetch=1,
                grid=(B, n_j, n_k),
                in_specs=[pl.BlockSpec((1, block_t, D), lambda b, j, k, r: (b, k, 0)),
                          pl.BlockSpec((1, block_t, D), lambda b, j, k, r: (b, k, 0)),
                          pl.BlockSpec((1, block_t, block_d), lambda b, j, k, r: (b, k, j)),
                          pl.BlockSpec((1, block_t, block_d), lambda b, j, k, r: (b, k, j)),
                          pl.BlockSpec((D, p_cols), lambda b, j, k, r: (0, 0))],
                out_specs=pl.BlockSpec((1, 1, 128), lambda b, j, k, r: (b, 0, 0)),
                scratch_shapes=[pltpu.SMEM((8,), jnp.float32),
                                pltpu.VMEM((1, D), jnp.float32),
                                pltpu.VMEM((D, block_d), jnp.float32),   # P col block
                                pltpu.VMEM((D, block_d), jnp.float32),   # Q col block
                                pltpu.VMEM((D, block_d), jnp.float32),   # R col block
                                pltpu.VMEM((D, block_d), jnp.float32),   # cov-diff col block
                                pltpu.VMEM((2, 1, D), jnp.float32)]),
            compiler_params=pltpu.CompilerParams(
                dimension_semantics=("parallel", "arbitrary", "arbitrary"),
                vmem_limit_bytes=vmem_limit),
        )(ratio, teacher_hidden_states, student_hidden_states,
          teacher_hidden_states, student_hidden_states, P)

    # ---- final weighted combine (cheap, done once in the JAX wrapper) ----
    c = comps[:, 0, :7]
    content_l = jnp.mean(c[:, 0]) / T * D ** (-0.5)
    cosine_l = jnp.mean(c[:, 1]) / T
    context_l = jnp.mean(c[:, 2]) / T ** 2
    local_l = jnp.mean(c[:, 3]) / (T * chunk_size) * chunk_size ** 0.5
    global_l = jnp.mean(c[:, 4]) / D * D ** 0.5
    temporal_l = jnp.mean(c[:, 5]) if T > 1 else 0.0
    spectral_l = jnp.mean(c[:, 6]) / D

    rel = layer_idx / n_layer
    loss = ((1.0 - 0.3 * rel) * content_l
            + 2.0 * cosine_l
            + (1.0 + 0.5 * rel) * context_l
            + local_weight * local_l
            + global_weight * global_l
            + temporal_weight * temporal_l
            + spectral_weight * spectral_l)
    return teacher_hidden_states, loss


# --------------------------------------------------------------------------------------
# pure-JAX reference (transcription of comprehensive_attention_mimicking_loss)
# --------------------------------------------------------------------------------------
def _reference_loss(t, s, layer_idx, n_layer, lw, gw, tw, sw):
    B, T, D = t.shape
    t = t.astype(jnp.float32)
    s = s.astype(jnp.float32)
    t_scale = jnp.mean(jnp.abs(t), axis=(1, 2), keepdims=True)
    s_scale = jnp.mean(jnp.abs(s), axis=(1, 2), keepdims=True)
    ratio = t_scale / (s_scale + 1e-8)
    content = jnp.mean(jnp.linalg.norm(t - ratio * s, axis=-1)) * D ** (-0.5)
    nt = jnp.linalg.norm(t, axis=-1)
    ns = jnp.linalg.norm(s, axis=-1)
    cos = jnp.sum(t * s, axis=-1) / jnp.maximum(nt * ns, 1e-8)
    cosine = jnp.mean(1.0 - cos)
    tn = t / jnp.maximum(nt, 1e-12)[..., None]
    sn = s / jnp.maximum(ns, 1e-12)[..., None]
    tc = jnp.einsum('bij,bkj->bik', tn, tn)
    sc = jnp.einsum('bij,bkj->bik', sn, sn)
    context = jnp.mean(jnp.sqrt(jnp.sum((tc - sc) ** 2, axis=(1, 2)))) / T ** 2
    cs = max(1, D // 16)
    nc = D // cs
    lt = t.reshape(B, T, nc, cs).mean(axis=-2)
    ls = s.reshape(B, T, nc, cs).mean(axis=-2)
    local = jnp.mean((lt - ls) ** 2) * cs ** 0.5
    gt = t.mean(axis=1)
    gs = s.mean(axis=1)
    glob = jnp.mean((gt - gs) ** 2) * D ** 0.5
    if T > 1:
        dt = (t[:, 1:] - t[:, :-1]).reshape(B, -1)
        ds = (s[:, 1:] - s[:, :-1]).reshape(B, -1)
        tcos = jnp.sum(dt * ds, -1) / jnp.maximum(
            jnp.linalg.norm(dt, axis=-1) * jnp.linalg.norm(ds, axis=-1), 1e-8)
        temporal = jnp.mean(1.0 - tcos)
    else:
        temporal = 0.0
    cov_t = jnp.einsum('bti,btj->bij', t, t) / T
    cov_s = jnp.einsum('bti,btj->bij', s, s) / T
    spectral = jnp.mean(jnp.sqrt(jnp.sum((cov_t - cov_s) ** 2, axis=(1, 2)))) / D
    rel = layer_idx / n_layer
    return ((1.0 - 0.3 * rel) * content + 2.0 * cosine + (1.0 + 0.5 * rel) * context
            + lw * local + gw * glob + tw * temporal + sw * spectral)


if __name__ == "__main__":
    key = jax.random.PRNGKey(0)
    k1, k2, k3, k4 = jax.random.split(key, 4)

    # ---- small shape, full-accumulator path ----
    B, T, D = 2, 8, 32
    teacher_hidden_states = jax.random.normal(k1, (B, T, D), dtype=jnp.float32)
    student_hidden_states = jax.random.normal(k2, (B, T, D), dtype=jnp.float32)
    ref = _reference_loss(teacher_hidden_states, student_hidden_states,
                          3, 32, 0.5, 0.5, 1.0, 0.3)

    # exact check: f32 MXU operands
    out_hidden, loss = attention_wrapper_forward(
        teacher_hidden_states, student_hidden_states, matmul_dtype=jnp.float32)
    jax.block_until_ready((out_hidden, loss))
    assert jnp.allclose(out_hidden, teacher_hidden_states), "pass-through mismatch"
    assert jnp.allclose(loss, ref, rtol=1e-4, atol=1e-4), (float(loss), float(ref))

    # default (production) path: f32 inputs, bf16 MXU operands, f32 accumulation
    _, loss_mm16 = attention_wrapper_forward(teacher_hidden_states, student_hidden_states)
    jax.block_until_ready(loss_mm16)
    assert jnp.allclose(loss_mm16, ref, rtol=3e-2, atol=3e-2), (float(loss_mm16), float(ref))

    # bf16 inputs
    t_bf = teacher_hidden_states.astype(jnp.bfloat16)
    s_bf = student_hidden_states.astype(jnp.bfloat16)
    _, loss_bf = attention_wrapper_forward(t_bf, s_bf)
    jax.block_until_ready(loss_bf)
    ref_bf = _reference_loss(t_bf.astype(jnp.float32), s_bf.astype(jnp.float32),
                             3, 32, 0.5, 0.5, 1.0, 0.3)
    assert jnp.allclose(loss_bf, ref_bf, rtol=3e-2, atol=3e-2), (float(loss_bf), float(ref_bf))

    # ---- D-column-tiled accumulator path (v7x large-D layout), exercised at small shapes ----
    B2, T2, D2 = 2, 16, 256
    t2 = jax.random.normal(k3, (B2, T2, D2), dtype=jnp.float32)
    s2 = jax.random.normal(k4, (B2, T2, D2), dtype=jnp.float32)
    _, loss_tiled = attention_wrapper_forward(t2, s2, matmul_dtype=jnp.float32,
                                              block_d=128, block_t=8)
    jax.block_until_ready(loss_tiled)
    ref2 = _reference_loss(t2, s2, 3, 32, 0.5, 0.5, 1.0, 0.3)
    assert jnp.allclose(loss_tiled, ref2, rtol=1e-4, atol=1e-4), (float(loss_tiled), float(ref2))

    print("KERNEL_OK")
</pallas_src>

<mosaic_0001>
module attributes {stable_mosaic.version = 11 : i64} {
  func.func @_loss_kernel_full(%arg0: i32, %arg1: i32, %arg2: memref<2xf32, #tpu.memory_space<smem>>, %arg3: memref<1x8x32xf32, #tpu.memory_space<vmem>>, %arg4: memref<1x8x32xf32, #tpu.memory_space<vmem>>, %arg5: memref<32x128xf32, #tpu.memory_space<vmem>>, %arg6: memref<1x1x128xf32, #tpu.memory_space<vmem>>, %arg7: memref<8xf32, #tpu.memory_space<smem>>, %arg8: memref<1x32xf32, #tpu.memory_space<vmem>>, %arg9: memref<32x32xf32, #tpu.memory_space<vmem>>, %arg10: memref<32x32xf32, #tpu.memory_space<vmem>>, %arg11: memref<32x32xf32, #tpu.memory_space<vmem>>, %arg12: memref<32x32xf32, #tpu.memory_space<vmem>>, %arg13: memref<2x1x32xf32, #tpu.memory_space<vmem>>) attributes {dimension_semantics = [#tpu.dimension_semantics<parallel>, #tpu.dimension_semantics<arbitrary>], iteration_bounds = array<i64: 2, 1>, scalar_prefetch = 1 : i64, scratch_operands = 7 : i64, tpu.core_type = #tpu.core_type<tc>, window_params = [{transform_indices = @transform_0, window_bounds = array<i64: 1, 8, 32>}, {transform_indices = @transform_1, window_bounds = array<i64: 1, 8, 32>}, {pipeline_mode = #tpu.pipeline_mode<synchronous>, transform_indices = @transform_2, window_bounds = array<i64: 32, 128>}, {transform_indices = @transform_3, window_bounds = array<i64: 1, 1, 128>}]} {
    %c0_i32 = arith.constant 0 : i32
    %0 = arith.cmpi eq, %arg1, %c0_i32 : i32
    %1 = arith.extui %0 : i1 to i32
    %c0_i32_0 = arith.constant 0 : i32
    %2 = arith.cmpi ne, %1, %c0_i32_0 : i32
    scf.if %2 {
      %cst_72 = arith.constant 0.000000e+00 : f32
      %c0_73 = arith.constant 0 : index
      %166 = memref.load %arg7[%c0_73] : memref<8xf32, #tpu.memory_space<smem>>
      memref.store %cst_72, %arg7[%c0_73] : memref<8xf32, #tpu.memory_space<smem>>
      %cst_74 = arith.constant 0.000000e+00 : f32
      %c1_75 = arith.constant 1 : index
      %167 = memref.load %arg7[%c1_75] : memref<8xf32, #tpu.memory_space<smem>>
      memref.store %cst_74, %arg7[%c1_75] : memref<8xf32, #tpu.memory_space<smem>>
      %cst_76 = arith.constant 0.000000e+00 : f32
      %c2_77 = arith.constant 2 : index
      %168 = memref.load %arg7[%c2_77] : memref<8xf32, #tpu.memory_space<smem>>
      memref.store %cst_76, %arg7[%c2_77] : memref<8xf32, #tpu.memory_space<smem>>
      %cst_78 = arith.constant 0.000000e+00 : f32
      %c3_79 = arith.constant 3 : index
      %169 = memref.load %arg7[%c3_79] : memref<8xf32, #tpu.memory_space<smem>>
      memref.store %cst_78, %arg7[%c3_79] : memref<8xf32, #tpu.memory_space<smem>>
      %cst_80 = arith.constant 0.000000e+00 : f32
      %c4_81 = arith.constant 4 : index
      %170 = memref.load %arg7[%c4_81] : memref<8xf32, #tpu.memory_space<smem>>
      memref.store %cst_80, %arg7[%c4_81] : memref<8xf32, #tpu.memory_space<smem>>
      %cst_82 = arith.constant 0.000000e+00 : f32
      %c5_83 = arith.constant 5 : index
      %171 = memref.load %arg7[%c5_83] : memref<8xf32, #tpu.memory_space<smem>>
      memref.store %cst_82, %arg7[%c5_83] : memref<8xf32, #tpu.memory_space<smem>>
      %cst_84 = arith.constant 0.000000e+00 : f32
      %c6 = arith.constant 6 : index
      %172 = memref.load %arg7[%c6] : memref<8xf32, #tpu.memory_space<smem>>
      memref.store %cst_84, %arg7[%c6] : memref<8xf32, #tpu.memory_space<smem>>
      %cst_85 = arith.constant 0.000000e+00 : f32
      %c7 = arith.constant 7 : index
      %173 = memref.load %arg7[%c7] : memref<8xf32, #tpu.memory_space<smem>>
      memref.store %cst_85, %arg7[%c7] : memref<8xf32, #tpu.memory_space<smem>>
      %cst_86 = arith.constant 0.000000e+00 : f32
      %174 = vector.broadcast %cst_86 : f32 to vector<1x32xf32>
      %c0_87 = arith.constant 0 : index
      %c0_88 = arith.constant 0 : index
      %175 = vector.load %arg8[%c0_87, %c0_88] : memref<1x32xf32, #tpu.memory_space<vmem>>, vector<1x32xf32>
      tpu.vector_store %arg8[%c0_87, %c0_88], %174 {strides = array<i32>} : memref<1x32xf32, #tpu.memory_space<vmem>>, vector<1x32xf32>,
      %cst_89 = arith.constant 0.000000e+00 : f32
      %176 = vector.broadcast %cst_89 : f32 to vector<32x32xf32>
      %c0_90 = arith.constant 0 : index
      %c0_91 = arith.constant 0 : index
      %177 = vector.load %arg9[%c0_90, %c0_91] : memref<32x32xf32, #tpu.memory_space<vmem>>, vector<32x32xf32>
      tpu.vector_store %arg9[%c0_90, %c0_91], %176 {strides = array<i32>} : memref<32x32xf32, #tpu.memory_space<vmem>>, vector<32x32xf32>,
      %cst_92 = arith.constant 0.000000e+00 : f32
      %178 = vector.broadcast %cst_92 : f32 to vector<32x32xf32>
      %c0_93 = arith.constant 0 : index
      %c0_94 = arith.constant 0 : index
      %179 = vector.load %arg10[%c0_93, %c0_94] : memref<32x32xf32, #tpu.memory_space<vmem>>, vector<32x32xf32>
      tpu.vector_store %arg10[%c0_93, %c0_94], %178 {strides = array<i32>} : memref<32x32xf32, #tpu.memory_space<vmem>>, vector<32x32xf32>,
      %cst_95 = arith.constant 0.000000e+00 : f32
      %180 = vector.broadcast %cst_95 : f32 to vector<32x32xf32>
      %c0_96 = arith.constant 0 : index
      %c0_97 = arith.constant 0 : index
      %181 = vector.load %arg11[%c0_96, %c0_97] : memref<32x32xf32, #tpu.memory_space<vmem>>, vector<32x32xf32>
      tpu.vector_store %arg11[%c0_96, %c0_97], %180 {strides = array<i32>} : memref<32x32xf32, #tpu.memory_space<vmem>>, vector<32x32xf32>,
      %cst_98 = arith.constant 0.000000e+00 : f32
      %182 = vector.broadcast %cst_98 : f32 to vector<32x32xf32>
      %c0_99 = arith.constant 0 : index
      %c0_100 = arith.constant 0 : index
      %183 = vector.load %arg12[%c0_99, %c0_100] : memref<32x32xf32, #tpu.memory_space<vmem>>, vector<32x32xf32>
      tpu.vector_store %arg12[%c0_99, %c0_100], %182 {strides = array<i32>} : memref<32x32xf32, #tpu.memory_space<vmem>>, vector<32x32xf32>,
      %cst_101 = arith.constant 0.000000e+00 : f32
      %184 = vector.broadcast %cst_101 : f32 to vector<2x1x32xf32>
      %c0_102 = arith.constant 0 : index
      %c0_103 = arith.constant 0 : index
      %c0_104 = arith.constant 0 : index
      %185 = vector.load %arg13[%c0_102, %c0_103, %c0_104] : memref<2x1x32xf32, #tpu.memory_space<vmem>>, vector<2x1x32xf32>
      tpu.vector_store %arg13[%c0_102, %c0_103, %c0_104], %184 {strides = array<i32>} : memref<2x1x32xf32, #tpu.memory_space<vmem>>, vector<2x1x32xf32>,
    } else {
    }
    %c0 = arith.constant 0 : index
    %c0_1 = arith.constant 0 : index
    %c0_2 = arith.constant 0 : index
    %3 = vector.load %arg3[%c0, %c0_1, %c0_2] : memref<1x8x32xf32, #tpu.memory_space<vmem>>, vector<1x8x32xf32>
    %4 = vector.shape_cast %3 : vector<1x8x32xf32> to vector<8x32xf32>
    %c0_3 = arith.constant 0 : index
    %c0_4 = arith.constant 0 : index
    %c0_5 = arith.constant 0 : index
    %5 = vector.load %arg4[%c0_3, %c0_4, %c0_5] : memref<1x8x32xf32, #tpu.memory_space<vmem>>, vector<1x8x32xf32>
    %6 = vector.shape_cast %5 : vector<1x8x32xf32> to vector<8x32xf32>
    %7 = arith.index_cast %arg0 : i32 to index
    %8 = memref.load %arg2[%7] : memref<2xf32, #tpu.memory_space<smem>>
    %9 = arith.mulf %4, %4 : vector<8x32xf32>
    %cst = arith.constant dense<0.000000e+00> : vector<8xf32>
    %10 = vector.multi_reduction <add>, %9, %cst [1] : vector<8x32xf32> to vector<8xf32>
    %11 = vector.shape_cast %10 : vector<8xf32> to vector<8x1xf32>
    %12 = arith.mulf %6, %6 : vector<8x32xf32>
    %cst_6 = arith.constant dense<0.000000e+00> : vector<8xf32>
    %13 = vector.multi_reduction <add>, %12, %cst_6 [1] : vector<8x32xf32> to vector<8xf32>
    %14 = vector.shape_cast %13 : vector<8xf32> to vector<8x1xf32>
    %15 = arith.mulf %4, %6 : vector<8x32xf32>
    %cst_7 = arith.constant dense<0.000000e+00> : vector<8xf32>
    %16 = vector.multi_reduction <add>, %15, %cst_7 [1] : vector<8x32xf32> to vector<8xf32>
    %17 = vector.shape_cast %16 : vector<8xf32> to vector<8x1xf32>
    %18 = vector.broadcast %8 : f32 to vector<8x32xf32>
    %19 = arith.mulf %18, %6 : vector<8x32xf32>
    %20 = arith.subf %4, %19 : vector<8x32xf32>
    %c0_8 = arith.constant 0 : index
    %21 = memref.load %arg7[%c0_8] : memref<8xf32, #tpu.memory_space<smem>>
    %22 = arith.mulf %20, %20 : vector<8x32xf32>
    %cst_9 = arith.constant dense<0.000000e+00> : vector<8xf32>
    %23 = vector.multi_reduction <add>, %22, %cst_9 [1] : vector<8x32xf32> to vector<8xf32>
    %24 = vector.shape_cast %23 : vector<8xf32> to vector<8x1xf32>
    %25 = math.sqrt %24 : vector<8x1xf32>
    %26 = vector.shape_cast %25 : vector<8x1xf32> to vector<1x8x1xf32>
    %cst_10 = arith.constant dense<0.000000e+00> : vector<1xf32>
    %27 = vector.multi_reduction <add>, %26, %cst_10 [1, 2] : vector<1x8x1xf32> to vector<1xf32>
    %28 = vector.shape_cast %27 : vector<1xf32> to vector<1x1x1xf32>
    %29 = vector.extract %28[0, 0, 0] : f32 from vector<1x1x1xf32>
    %30 = arith.addf %21, %29 : f32
    %c0_11 = arith.constant 0 : index
    %31 = memref.load %arg7[%c0_11] : memref<8xf32, #tpu.memory_space<smem>>
    memref.store %30, %arg7[%c0_11] : memref<8xf32, #tpu.memory_space<smem>>
    %32 = math.sqrt %11 : vector<8x1xf32>
    %33 = math.sqrt %14 : vector<8x1xf32>
    %34 = arith.mulf %32, %33 : vector<8x1xf32>
    %cst_12 = arith.constant 9.99999993E-9 : f32
    %35 = vector.broadcast %cst_12 : f32 to vector<8x1xf32>
    %36 = arith.maximumf %34, %35 : vector<8x1xf32>
    %c1 = arith.constant 1 : index
    %37 = memref.load %arg7[%c1] : memref<8xf32, #tpu.memory_space<smem>>
    %38 = arith.divf %17, %36 : vector<8x1xf32>
    %cst_13 = arith.constant 1.000000e+00 : f32
    %39 = vector.broadcast %cst_13 : f32 to vector<8x1xf32>
    %40 = arith.subf %39, %38 : vector<8x1xf32>
    %41 = vector.shape_cast %40 : vector<8x1xf32> to vector<1x8x1xf32>
    %cst_14 = arith.constant dense<0.000000e+00> : vector<1xf32>
    %42 = vector.multi_reduction <add>, %41, %cst_14 [1, 2] : vector<1x8x1xf32> to vector<1xf32>
    %43 = vector.shape_cast %42 : vector<1xf32> to vector<1x1x1xf32>
    %44 = vector.extract %43[0, 0, 0] : f32 from vector<1x1x1xf32>
    %45 = arith.addf %37, %44 : f32
    %c1_15 = arith.constant 1 : index
    %46 = memref.load %arg7[%c1_15] : memref<8xf32, #tpu.memory_space<smem>>
    memref.store %45, %arg7[%c1_15] : memref<8xf32, #tpu.memory_space<smem>>
    %47 = arith.subf %4, %6 : vector<8x32xf32>
    %c0_16 = arith.constant 0 : index
    %c0_17 = arith.constant 0 : index
    %48 = vector.load %arg5[%c0_16, %c0_17] : memref<32x128xf32, #tpu.memory_space<vmem>>, vector<32x128xf32>
    %cst_18 = arith.constant dense<0.000000e+00> : vector<8x128xf32>
    %49 = tpu.matmul %47, %48, %cst_18 {dimension_numbers = #tpu.dot_dimension_numbers<[1], [0], [0], [1], [0, 0, 1, 1], [], []>} : vector<8x32xf32>, vector<32x128xf32>, vector<8x128xf32> -> vector<8x128xf32>
    %c2 = arith.constant 2 : index
    %50 = memref.load %arg7[%c2] : memref<8xf32, #tpu.memory_space<smem>>
    %51 = arith.mulf %49, %49 : vector<8x128xf32>
    %52 = vector.shape_cast %51 : vector<8x128xf32> to vector<1x8x128xf32>
    %cst_19 = arith.constant dense<0.000000e+00> : vector<1xf32>
    %53 = vector.multi_reduction <add>, %52, %cst_19 [1, 2] : vector<1x8x128xf32> to vector<1xf32>
    %54 = vector.shape_cast %53 : vector<1xf32> to vector<1x1x1xf32>
    %55 = vector.extract %54[0, 0, 0] : f32 from vector<1x1x1xf32>
    %56 = arith.addf %50, %55 : f32
    %c2_20 = arith.constant 2 : index
    %57 = memref.load %arg7[%c2_20] : memref<8xf32, #tpu.memory_space<smem>>
    memref.store %56, %arg7[%c2_20] : memref<8xf32, #tpu.memory_space<smem>>
    %c0_21 = arith.constant 0 : index
    %c0_22 = arith.constant 0 : index
    %58 = vector.load %arg8[%c0_21, %c0_22] : memref<1x32xf32, #tpu.memory_space<vmem>>, vector<1x32xf32>
    %cst_23 = arith.constant dense<0.000000e+00> : vector<32xf32>
    %59 = vector.multi_reduction <add>, %47, %cst_23 [0] : vector<8x32xf32> to vector<32xf32>
    %60 = vector.shape_cast %59 : vector<32xf32> to vector<1x32xf32>
    %61 = arith.addf %58, %60 : vector<1x32xf32>
    %c0_24 = arith.constant 0 : index
    %c0_25 = arith.constant 0 : index
    %62 = vector.load %arg8[%c0_24, %c0_25] : memref<1x32xf32, #tpu.memory_space<vmem>>, vector<1x32xf32>
    tpu.vector_store %arg8[%c0_24, %c0_25], %61 {strides = array<i32>} : memref<1x32xf32, #tpu.memory_space<vmem>>, vector<1x32xf32>,
    %c0_i32_26 = arith.constant 0 : i32
    %63 = arith.cmpi sgt, %arg1, %c0_i32_26 : i32
    %64 = arith.extui %63 : i1 to i32
    %65 = arith.sitofp %64 : i32 to f32
    %66 = vector.extract_strided_slice %4 {offsets = [0, 0], sizes = [1, 32], strides = [1, 1]} : vector<8x32xf32> to vector<1x32xf32>
    %c0_27 = arith.constant 0 : index
    %c0_28 = arith.constant 0 : index
    %c0_29 = arith.constant 0 : index
    %67 = vector.load %arg13[%c0_27, %c0_28, %c0_29] : memref<2x1x32xf32, #tpu.memory_space<vmem>>, vector<1x1x32xf32>
    %68 = vector.shape_cast %67 : vector<1x1x32xf32> to vector<1x32xf32>
    %69 = arith.subf %66, %68 : vector<1x32xf32>
    %70 = vector.extract_strided_slice %6 {offsets = [0, 0], sizes = [1, 32], strides = [1, 1]} : vector<8x32xf32> to vector<1x32xf32>
    %c1_30 = arith.constant 1 : index
    %c0_31 = arith.constant 0 : index
    %c0_32 = arith.constant 0 : index
    %71 = vector.load %arg13[%c1_30, %c0_31, %c0_32] : memref<2x1x32xf32, #tpu.memory_space<vmem>>, vector<1x1x32xf32>
    %72 = vector.shape_cast %71 : vector<1x1x32xf32> to vector<1x32xf32>
    %73 = arith.subf %70, %72 : vector<1x32xf32>
    %74 = arith.mulf %69, %73 : vector<1x32xf32>
    %75 = vector.shape_cast %74 : vector<1x32xf32> to vector<1x1x32xf32>
    %cst_33 = arith.constant dense<0.000000e+00> : vector<1xf32>
    %76 = vector.multi_reduction <add>, %75, %cst_33 [1, 2] : vector<1x1x32xf32> to vector<1xf32>
    %77 = vector.shape_cast %76 : vector<1xf32> to vector<1x1x1xf32>
    %78 = vector.extract %77[0, 0, 0] : f32 from vector<1x1x1xf32>
    %79 = arith.mulf %65, %78 : f32
    %80 = arith.mulf %69, %69 : vector<1x32xf32>
    %81 = vector.shape_cast %80 : vector<1x32xf32> to vector<1x1x32xf32>
    %cst_34 = arith.constant dense<0.000000e+00> : vector<1xf32>
    %82 = vector.multi_reduction <add>, %81, %cst_34 [1, 2] : vector<1x1x32xf32> to vector<1xf32>
    %83 = vector.shape_cast %82 : vector<1xf32> to vector<1x1x1xf32>
    %84 = vector.extract %83[0, 0, 0] : f32 from vector<1x1x1xf32>
    %85 = arith.mulf %65, %84 : f32
    %86 = arith.mulf %73, %73 : vector<1x32xf32>
    %87 = vector.shape_cast %86 : vector<1x32xf32> to vector<1x1x32xf32>
    %cst_35 = arith.constant dense<0.000000e+00> : vector<1xf32>
    %88 = vector.multi_reduction <add>, %87, %cst_35 [1, 2] : vector<1x1x32xf32> to vector<1xf32>
    %89 = vector.shape_cast %88 : vector<1xf32> to vector<1x1x1xf32>
    %90 = vector.extract %89[0, 0, 0] : f32 from vector<1x1x1xf32>
    %91 = arith.mulf %65, %90 : f32
    %92 = vector.extract_strided_slice %4 {offsets = [1, 0], sizes = [7, 32], strides = [1, 1]} : vector<8x32xf32> to vector<7x32xf32>
    %93 = vector.extract_strided_slice %4 {offsets = [0, 0], sizes = [7, 32], strides = [1, 1]} : vector<8x32xf32> to vector<7x32xf32>
    %94 = arith.subf %92, %93 : vector<7x32xf32>
    %95 = vector.extract_strided_slice %6 {offsets = [1, 0], sizes = [7, 32], strides = [1, 1]} : vector<8x32xf32> to vector<7x32xf32>
    %96 = vector.extract_strided_slice %6 {offsets = [0, 0], sizes = [7, 32], strides = [1, 1]} : vector<8x32xf32> to vector<7x32xf32>
    %97 = arith.subf %95, %96 : vector<7x32xf32>
    %98 = arith.mulf %94, %97 : vector<7x32xf32>
    %99 = vector.shape_cast %98 : vector<7x32xf32> to vector<1x7x32xf32>
    %cst_36 = arith.constant dense<0.000000e+00> : vector<1xf32>
    %100 = vector.multi_reduction <add>, %99, %cst_36 [1, 2] : vector<1x7x32xf32> to vector<1xf32>
    %101 = vector.shape_cast %100 : vector<1xf32> to vector<1x1x1xf32>
    %102 = vector.extract %101[0, 0, 0] : f32 from vector<1x1x1xf32>
    %103 = arith.addf %79, %102 : f32
    %104 = arith.mulf %94, %94 : vector<7x32xf32>
    %105 = vector.shape_cast %104 : vector<7x32xf32> to vector<1x7x32xf32>
    %cst_37 = arith.constant dense<0.000000e+00> : vector<1xf32>
    %106 = vector.multi_reduction <add>, %105, %cst_37 [1, 2] : vector<1x7x32xf32> to vector<1xf32>
    %107 = vector.shape_cast %106 : vector<1xf32> to vector<1x1x1xf32>
    %108 = vector.extract %107[0, 0, 0] : f32 from vector<1x1x1xf32>
    %109 = arith.addf %85, %108 : f32
    %110 = arith.mulf %97, %97 : vector<7x32xf32>
    %111 = vector.shape_cast %110 : vector<7x32xf32> to vector<1x7x32xf32>
    %cst_38 = arith.constant dense<0.000000e+00> : vector<1xf32>
    %112 = vector.multi_reduction <add>, %111, %cst_38 [1, 2] : vector<1x7x32xf32> to vector<1xf32>
    %113 = vector.shape_cast %112 : vector<1xf32> to vector<1x1x1xf32>
    %114 = vector.extract %113[0, 0, 0] : f32 from vector<1x1x1xf32>
    %115 = arith.addf %91, %114 : f32
    %c3 = arith.constant 3 : index
    %116 = memref.load %arg7[%c3] : memref<8xf32, #tpu.memory_space<smem>>
    %117 = arith.addf %116, %103 : f32
    %c3_39 = arith.constant 3 : index
    %118 = memref.load %arg7[%c3_39] : memref<8xf32, #tpu.memory_space<smem>>
    memref.store %117, %arg7[%c3_39] : memref<8xf32, #tpu.memory_space<smem>>
    %c4 = arith.constant 4 : index
    %119 = memref.load %arg7[%c4] : memref<8xf32, #tpu.memory_space<smem>>
    %120 = arith.addf %119, %109 : f32
    %c4_40 = arith.constant 4 : index
    %121 = memref.load %arg7[%c4_40] : memref<8xf32, #tpu.memory_space<smem>>
    memref.store %120, %arg7[%c4_40] : memref<8xf32, #tpu.memory_space<smem>>
    %c5 = arith.constant 5 : index
    %122 = memref.load %arg7[%c5] : memref<8xf32, #tpu.memory_space<smem>>
    %123 = arith.addf %122, %115 : f32
    %c5_41 = arith.constant 5 : index
    %124 = memref.load %arg7[%c5_41] : memref<8xf32, #tpu.memory_space<smem>>
    memref.store %123, %arg7[%c5_41] : memref<8xf32, #tpu.memory_space<smem>>
    %125 = vector.extract_strided_slice %4 {offsets = [7, 0], sizes = [1, 32], strides = [1, 1]} : vector<8x32xf32> to vector<1x32xf32>
    %c0_42 = arith.constant 0 : index
    %c0_43 = arith.constant 0 : index
    %c0_44 = arith.constant 0 : index
    %126 = vector.load %arg13[%c0_42, %c0_43, %c0_44] : memref<2x1x32xf32, #tpu.memory_space<vmem>>, vector<1x1x32xf32>
    %127 = vector.shape_cast %126 : vector<1x1x32xf32> to vector<1x32xf32>
    %128 = vector.shape_cast %125 : vector<1x32xf32> to vector<1x1x32xf32>
    tpu.vector_store %arg13[%c0_42, %c0_43, %c0_44], %128 {strides = array<i32>} : memref<2x1x32xf32, #tpu.memory_space<vmem>>, vector<1x1x32xf32>,
    %129 = vector.extract_strided_slice %6 {offsets = [7, 0], sizes = [1, 32], strides = [1, 1]} : vector<8x32xf32> to vector<1x32xf32>
    %c1_45 = arith.constant 1 : index
    %c0_46 = arith.constant 0 : index
    %c0_47 = arith.constant 0 : index
    %130 = vector.load %arg13[%c1_45, %c0_46, %c0_47] : memref<2x1x32xf32, #tpu.memory_space<vmem>>, vector<1x1x32xf32>
    %131 = vector.shape_cast %130 : vector<1x1x32xf32> to vector<1x32xf32>
    %132 = vector.shape_cast %129 : vector<1x32xf32> to vector<1x1x32xf32>
    tpu.vector_store %arg13[%c1_45, %c0_46, %c0_47], %132 {strides = array<i32>} : memref<2x1x32xf32, #tpu.memory_space<vmem>>, vector<1x1x32xf32>,
    %cst_48 = arith.constant 1.000000e-24 : f32
    %133 = vector.broadcast %cst_48 : f32 to vector<8x1xf32>
    %134 = arith.maximumf %11, %133 : vector<8x1xf32>
    %135 = math.rsqrt %134 : vector<8x1xf32>
    %136 = vector.broadcast %135 : vector<8x1xf32> to vector<8x32xf32>
    %137 = arith.mulf %4, %136 : vector<8x32xf32>
    %cst_49 = arith.constant 1.000000e-24 : f32
    %138 = vector.broadcast %cst_49 : f32 to vector<8x1xf32>
    %139 = arith.maximumf %14, %138 : vector<8x1xf32>
    %140 = math.rsqrt %139 : vector<8x1xf32>
    %141 = vector.broadcast %140 : vector<8x1xf32> to vector<8x32xf32>
    %142 = arith.mulf %6, %141 : vector<8x32xf32>
    %143 = arith.addf %137, %142 : vector<8x32xf32>
    %144 = arith.subf %137, %142 : vector<8x32xf32>
    %c0_50 = arith.constant 0 : index
    %c0_51 = arith.constant 0 : index
    %145 = vector.load %arg9[%c0_50, %c0_51] : memref<32x32xf32, #tpu.memory_space<vmem>>, vector<32x32xf32>
    %cst_52 = arith.constant dense<0.000000e+00> : vector<32x32xf32>
    %146 = tpu.matmul %143, %143, %cst_52 {dimension_numbers = #tpu.dot_dimension_numbers<[0], [0], [1], [1], [0, 1, 1, 1], [], []>} : vector<8x32xf32>, vector<8x32xf32>, vector<32x32xf32> -> vector<32x32xf32>
    %147 = arith.addf %145, %146 : vector<32x32xf32>
    %c0_53 = arith.constant 0 : index
    %c0_54 = arith.constant 0 : index
    %148 = vector.load %arg9[%c0_53, %c0_54] : memref<32x32xf32, #tpu.memory_space<vmem>>, vector<32x32xf32>
    tpu.vector_store %arg9[%c0_53, %c0_54], %147 {strides = array<i32>} : memref<32x32xf32, #tpu.memory_space<vmem>>, vector<32x32xf32>,
    %c0_55 = arith.constant 0 : index
    %c0_56 = arith.constant 0 : index
    %149 = vector.load %arg10[%c0_55, %c0_56] : memref<32x32xf32, #tpu.memory_space<vmem>>, vector<32x32xf32>
    %cst_57 = arith.constant dense<0.000000e+00> : vector<32x32xf32>
    %150 = tpu.matmul %144, %144, %cst_57 {dimension_numbers = #tpu.dot_dimension_numbers<[0], [0], [1], [1], [0, 1, 1, 1], [], []>} : vector<8x32xf32>, vector<8x32xf32>, vector<32x32xf32> -> vector<32x32xf32>
    %151 = arith.addf %149, %150 : vector<32x32xf32>
    %c0_58 = arith.constant 0 : index
    %c0_59 = arith.constant 0 : index
    %152 = vector.load %arg10[%c0_58, %c0_59] : memref<32x32xf32, #tpu.memory_space<vmem>>, vector<32x32xf32>
    tpu.vector_store %arg10[%c0_58, %c0_59], %151 {strides = array<i32>} : memref<32x32xf32, #tpu.memory_space<vmem>>, vector<32x32xf32>,
    %c0_60 = arith.constant 0 : index
    %c0_61 = arith.constant 0 : index
    %153 = vector.load %arg11[%c0_60, %c0_61] : memref<32x32xf32, #tpu.memory_space<vmem>>, vector<32x32xf32>
    %cst_62 = arith.constant dense<0.000000e+00> : vector<32x32xf32>
    %154 = tpu.matmul %143, %144, %cst_62 {dimension_numbers = #tpu.dot_dimension_numbers<[0], [0], [1], [1], [0, 1, 1, 1], [], []>} : vector<8x32xf32>, vector<8x32xf32>, vector<32x32xf32> -> vector<32x32xf32>
    %155 = arith.addf %153, %154 : vector<32x32xf32>
    %c0_63 = arith.constant 0 : index
    %c0_64 = arith.constant 0 : index
    %156 = vector.load %arg11[%c0_63, %c0_64] : memref<32x32xf32, #tpu.memory_space<vmem>>, vector<32x32xf32>
    tpu.vector_store %arg11[%c0_63, %c0_64], %155 {strides = array<i32>} : memref<32x32xf32, #tpu.memory_space<vmem>>, vector<32x32xf32>,
    %157 = arith.addf %4, %6 : vector<8x32xf32>
    %158 = arith.subf %4, %6 : vector<8x32xf32>
    %c0_65 = arith.constant 0 : index
    %c0_66 = arith.constant 0 : index
    %159 = vector.load %arg12[%c0_65, %c0_66] : memref<32x32xf32, #tpu.memory_space<vmem>>, vector<32x32xf32>
    %cst_67 = arith.constant dense<0.000000e+00> : vector<32x32xf32>
    %160 = tpu.matmul %157, %158, %cst_67 {dimension_numbers = #tpu.dot_dimension_numbers<[0], [0], [1], [1], [0, 1, 1, 1], [], []>} : vector<8x32xf32>, vector<8x32xf32>, vector<32x32xf32> -> vector<32x32xf32>
    %161 = arith.addf %159, %160 : vector<32x32xf32>
    %c0_68 = arith.constant 0 : index
    %c0_69 = arith.constant 0 : index
    %162 = vector.load %arg12[%c0_68, %c0_69] : memref<32x32xf32, #tpu.memory_space<vmem>>, vector<32x32xf32>
    tpu.vector_store %arg12[%c0_68, %c0_69], %161 {strides = array<i32>} : memref<32x32xf32, #tpu.memory_space<vmem>>, vector<32x32xf32>,
    %c0_i32_70 = arith.constant 0 : i32
    %163 = arith.cmpi eq, %arg1, %c0_i32_70 : i32
    %164 = arith.extui %163 : i1 to i32
    %c0_i32_71 = arith.constant 0 : i32
    %165 = arith.cmpi ne, %164, %c0_i32_71 : i32
    scf.if %165 {
      %c0_72 = arith.constant 0 : index
      %c0_73 = arith.constant 0 : index
      %166 = vector.load %arg9[%c0_72, %c0_73] : memref<32x32xf32, #tpu.memory_space<vmem>>, vector<32x32xf32>
      %c0_74 = arith.constant 0 : index
      %c0_75 = arith.constant 0 : index
      %167 = vector.load %arg10[%c0_74, %c0_75] : memref<32x32xf32, #tpu.memory_space<vmem>>, vector<32x32xf32>
      %c0_76 = arith.constant 0 : index
      %c0_77 = arith.constant 0 : index
      %168 = vector.load %arg11[%c0_76, %c0_77] : memref<32x32xf32, #tpu.memory_space<vmem>>, vector<32x32xf32>
      %169 = arith.mulf %166, %167 : vector<32x32xf32>
      %170 = vector.shape_cast %169 : vector<32x32xf32> to vector<1x32x32xf32>
      %cst_78 = arith.constant dense<0.000000e+00> : vector<1xf32>
      %171 = vector.multi_reduction <add>, %170, %cst_78 [1, 2] : vector<1x32x32xf32> to vector<1xf32>
      %172 = vector.shape_cast %171 : vector<1xf32> to vector<1x1x1xf32>
      %173 = vector.extract %172[0, 0, 0] : f32 from vector<1x1x1xf32>
      %174 = tpu.transpose %168, [1, 0] : vector<32x32xf32> -> vector<32x32xf32>
      %175 = arith.mulf %168, %174 : vector<32x32xf32>
      %176 = vector.shape_cast %175 : vector<32x32xf32> to vector<1x32x32xf32>
      %cst_79 = arith.constant dense<0.000000e+00> : vector<1xf32>
      %177 = vector.multi_reduction <add>, %176, %cst_79 [1, 2] : vector<1x32x32xf32> to vector<1xf32>
      %178 = vector.shape_cast %177 : vector<1xf32> to vector<1x1x1xf32>
      %179 = vector.extract %178[0, 0, 0] : f32 from vector<1x1x1xf32>
      %180 = arith.addf %173, %179 : f32
      %cst_80 = arith.constant 5.000000e-01 : f32
      %181 = arith.mulf %cst_80, %180 : f32
      %cst_81 = arith.constant 0.000000e+00 : f32
      %182 = arith.maximumf %181, %cst_81 : f32
      %183 = math.sqrt %182 : f32
      %c0_82 = arith.constant 0 : index
      %c0_83 = arith.constant 0 : index
      %184 = vector.load %arg12[%c0_82, %c0_83] : memref<32x32xf32, #tpu.memory_space<vmem>>, vector<32x32xf32>
      %185 = tpu.transpose %184, [1, 0] : vector<32x32xf32> -> vector<32x32xf32>
      %186 = arith.addf %184, %185 : vector<32x32xf32>
      %187 = arith.mulf %186, %186 : vector<32x32xf32>
      %188 = vector.shape_cast %187 : vector<32x32xf32> to vector<1x32x32xf32>
      %cst_84 = arith.constant dense<0.000000e+00> : vector<1xf32>
      %189 = vector.multi_reduction <add>, %188, %cst_84 [1, 2] : vector<1x32x32xf32> to vector<1xf32>
      %190 = vector.shape_cast %189 : vector<1xf32> to vector<1x1x1xf32>
      %191 = vector.extract %190[0, 0, 0] : f32 from vector<1x1x1xf32>
      %192 = math.sqrt %191 : f32
      %cst_85 = arith.constant 5.000000e-01 : f32
      %193 = arith.mulf %cst_85, %192 : f32
      %cst_86 = arith.constant 1.250000e-01 : f32
      %194 = arith.mulf %193, %cst_86 : f32
      %c0_87 = arith.constant 0 : index
      %c0_88 = arith.constant 0 : index
      %195 = vector.load %arg8[%c0_87, %c0_88] : memref<1x32xf32, #tpu.memory_space<vmem>>, vector<1x32xf32>
      %cst_89 = arith.constant 1.250000e-01 : f32
      %196 = vector.broadcast %cst_89 : f32 to vector<1x32xf32>
      %197 = arith.mulf %195, %196 : vector<1x32xf32>
      %198 = arith.mulf %197, %197 : vector<1x32xf32>
      %199 = vector.shape_cast %198 : vector<1x32xf32> to vector<1x1x32xf32>
      %cst_90 = arith.constant dense<0.000000e+00> : vector<1xf32>
      %200 = vector.multi_reduction <add>, %199, %cst_90 [1, 2] : vector<1x1x32xf32> to vector<1xf32>
      %201 = vector.shape_cast %200 : vector<1xf32> to vector<1x1x1xf32>
      %202 = vector.extract %201[0, 0, 0] : f32 from vector<1x1x1xf32>
      %c3_91 = arith.constant 3 : index
      %203 = memref.load %arg7[%c3_91] : memref<8xf32, #tpu.memory_space<smem>>
      %c4_92 = arith.constant 4 : index
      %204 = memref.load %arg7[%c4_92] : memref<8xf32, #tpu.memory_space<smem>>
      %c5_93 = arith.constant 5 : index
      %205 = memref.load %arg7[%c5_93] : memref<8xf32, #tpu.memory_space<smem>>
      %206 = arith.mulf %204, %205 : f32
      %207 = math.sqrt %206 : f32
      %cst_94 = arith.constant 9.99999993E-9 : f32
      %208 = arith.maximumf %207, %cst_94 : f32
      %209 = arith.divf %203, %208 : f32
      %cst_95 = arith.constant 1.000000e+00 : f32
      %210 = arith.subf %cst_95, %209 : f32
      %c0_96 = arith.constant 0 : index
      %211 = memref.load %arg7[%c0_96] : memref<8xf32, #tpu.memory_space<smem>>
      %c1_97 = arith.constant 1 : index
      %212 = memref.load %arg7[%c1_97] : memref<8xf32, #tpu.memory_space<smem>>
      %c2_98 = arith.constant 2 : index
      %213 = memref.load %arg7[%c2_98] : memref<8xf32, #tpu.memory_space<smem>>
      %214 = tpu.iota {dimensions = array<i32: 2>} : vector<1x1x128xi32>
      %cst_99 = arith.constant 0.000000e+00 : f32
      %215 = vector.broadcast %cst_99 : f32 to vector<1x1x128xf32>
      %c0_i32_100 = arith.constant 0 : i32
      %216 = vector.broadcast %c0_i32_100 : i32 to vector<1x1x128xi32>
      %217 = arith.cmpi eq, %214, %216 : vector<1x1x128xi32>
      %218 = vector.broadcast %211 : f32 to vector<1x1x128xf32>
      %219 = arith.select %217, %218, %215 : vector<1x1x128xi1>, vector<1x1x128xf32>
      %c1_i32 = arith.constant 1 : i32
      %220 = vector.broadcast %c1_i32 : i32 to vector<1x1x128xi32>
      %221 = arith.cmpi eq, %214, %220 : vector<1x1x128xi32>
      %222 = vector.broadcast %212 : f32 to vector<1x1x128xf32>
      %223 = arith.select %221, %222, %219 : vector<1x1x128xi1>, vector<1x1x128xf32>
      %c2_i32 = arith.constant 2 : i32
      %224 = vector.broadcast %c2_i32 : i32 to vector<1x1x128xi32>
      %225 = arith.cmpi eq, %214, %224 : vector<1x1x128xi32>
      %226 = vector.broadcast %183 : f32 to vector<1x1x128xf32>
      %227 = arith.select %225, %226, %223 : vector<1x1x128xi1>, vector<1x1x128xf32>
      %c3_i32 = arith.constant 3 : i32
      %228 = vector.broadcast %c3_i32 : i32 to vector<1x1x128xi32>
      %229 = arith.cmpi eq, %214, %228 : vector<1x1x128xi32>
      %230 = vector.broadcast %213 : f32 to vector<1x1x128xf32>
      %231 = arith.select %229, %230, %227 : vector<1x1x128xi1>, vector<1x1x128xf32>
      %c4_i32 = arith.constant 4 : i32
      %232 = vector.broadcast %c4_i32 : i32 to vector<1x1x128xi32>
      %233 = arith.cmpi eq, %214, %232 : vector<1x1x128xi32>
      %234 = vector.broadcast %202 : f32 to vector<1x1x128xf32>
      %235 = arith.select %233, %234, %231 : vector<1x1x128xi1>, vector<1x1x128xf32>
      %c5_i32 = arith.constant 5 : i32
      %236 = vector.broadcast %c5_i32 : i32 to vector<1x1x128xi32>
      %237 = arith.cmpi eq, %214, %236 : vector<1x1x128xi32>
      %238 = vector.broadcast %210 : f32 to vector<1x1x128xf32>
      %239 = arith.select %237, %238, %235 : vector<1x1x128xi1>, vector<1x1x128xf32>
      %c6_i32 = arith.constant 6 : i32
      %240 = vector.broadcast %c6_i32 : i32 to vector<1x1x128xi32>
      %241 = arith.cmpi eq, %214, %240 : vector<1x1x128xi32>
      %242 = vector.broadcast %194 : f32 to vector<1x1x128xf32>
      %243 = arith.select %241, %242, %239 : vector<1x1x128xi1>, vector<1x1x128xf32>
      %c0_101 = arith.constant 0 : index
      %c0_102 = arith.constant 0 : index
      %c0_103 = arith.constant 0 : index
      %244 = vector.load %arg6[%c0_101, %c0_102, %c0_103] : memref<1x1x128xf32, #tpu.memory_space<vmem>>, vector<1x1x128xf32>
      tpu.vector_store %arg6[%c0_101, %c0_102, %c0_103], %243 {strides = array<i32>} : memref<1x1x128xf32, #tpu.memory_space<vmem>>, vector<1x1x128xf32>,
    } else {
    }
    return
  }
  func.func @transform_0(%arg0: i32, %arg1: i32, %arg2: memref<2xf32, #tpu.memory_space<smem>>) -> (i32, i32, i32) {
    %c0_i32 = arith.constant 0 : i32
    %c0_i32_0 = arith.constant 0 : i32
    return %arg0, %arg1, %c0_i32 : i32, i32, i32
  }
  func.func @transform_1(%arg0: i32, %arg1: i32, %arg2: memref<2xf32, #tpu.memory_space<smem>>) -> (i32, i32, i32) {
    %c0_i32 = arith.constant 0 : i32
    %c0_i32_0 = arith.constant 0 : i32
    return %arg0, %arg1, %c0_i32 : i32, i32, i32
  }
  func.func @transform_2(%arg0: i32, %arg1: i32, %arg2: memref<2xf32, #tpu.memory_space<smem>>) -> (i32, i32) {
    %c0_i32 = arith.constant 0 : i32
    %c0_i32_0 = arith.constant 0 : i32
    %c0_i32_1 = arith.constant 0 : i32
    return %c0_i32, %c0_i32_0 : i32, i32
  }
  func.func @transform_3(%arg0: i32, %arg1: i32, %arg2: memref<2xf32, #tpu.memory_space<smem>>) -> (i32, i32, i32) {
    %c0_i32 = arith.constant 0 : i32
    %c0_i32_0 = arith.constant 0 : i32
    %c0_i32_1 = arith.constant 0 : i32
    return %arg0, %c0_i32, %c0_i32_0 : i32, i32, i32
  }
}

</mosaic_0001>

<bundles_post_ra>
// kernel: tpu_custom_call.1
= control target key start
LH: loop header
LB: loop body
LE: loop exit
PB: predicated region body
PF: predicated region fallthrough
CT: control target
= control target key end

     0   :  { %s2398_s0 = inlined_call_operand.hbm [shape: f32[2], index: 0, kind: input, shape index: {}]   ;;  %s2399_s1 = inlined_call_operand.hbm [shape: f32[2,8,32], index: 1, kind: input, shape index: {}]   ;;  %s2400_s2 = inlined_call_operand.hbm [shape: f32[2,8,32], index: 2, kind: input, shape index: {}]   ;;  %s2401_s3 = inlined_call_operand.hbm [shape: f32[32,128], index: 3, kind: input, shape index: {}]   ;;  %s2402_s4 = inlined_call_operand.hbm [shape: f32[2,1,128], index: 4, kind: output, shape index: {}]  }
   0x1   :  { %2408 = sst [smem:[#allocation24_spill]] %s2401_s3  ;;  %s1733_s17 = scalar_lea.hbm %s2398_s0, 16 }
   0x2   :  { %p1734_p0 = scmp.ne.s32.totalorder %s2398_s0, %s1733_s17  ;;  %p1737_p1 = scmp.lt.u32.totalorder %s1733_s17, %s2398_s0 }
   0x4   :  { %p1739_p2 = pnand %p1737_p1, %p1734_p0 }
   0x6   :  { %1742 = shalt.err (!%p1739_p2)  }
   0x7   :  { %s1925_s22 = smov [#allocation10]  }
   0x8   :  { %10 = dma.hbm_to_smem %s2398_s0, 16, %s1925_s22, [#allocation9] }
   0x9   :  { %1883 = dma.done.wait [#allocation9], 16 }
   0xa   :  { %1884 = vsyncadd [#allocation9], 4294967280 }
   0xb   :  { %12 = sfence }
   0xc   :  { %13 = vsyncpa [#allocation12], 0 }
   0xd   :  { %15 = vsyncpa [#allocation12 + $0x1], 0 }
   0xe   :  { %16 = vsyncpa [#allocation15], 0 }
   0xf   :  { %18 = vsyncpa [#allocation15 + $0x1], 0 }
  0x10   :  { %19 = vsyncpa [#allocation13], 0 }
  0x11   :  { %21 = vsyncpa [#allocation13 + $0x1], 0  ;;  %s1974_s25 = smov 0   ;;  %s1976_s26 = smov 0  }
  0x12   :  { %s1978_s27 = smov 0   ;;  %s1980_s28 = smov 0  }
  0x13   :  { %s1982_s29 = smov 0   ;;  %s1984_s0 = smov 0  }
  0x14 LB: > { %s2005_s30 = sadd.s32 4294967295, %s1923_s0   ;;  %s1475_s5 = sadd.s32 4294967294, %s1923_s0   ;;  %s1923_s0 = sphi %s1984_s0, %s27_s0   ;;  %s1919_s29 = sphi %s1982_s29, %s2431_s29   ;;  %s1915_s28 = sphi %s1980_s28, %s2430_s28   ;;  %s1911_s27 = sphi %s1978_s27, %s2429_s27   ;;  %s1907_s26 = sphi %s1976_s26, %s2428_s26   ;;  %s1903_s25 = sphi %s1974_s25, %s2427_s25  }
  0x15   : > { %p61_p3 = scmp.ne.s32.totalorder %s1907_s26, %s1903_s25  ;;  %p2403_p4 = scmp.eq.s32.totalorder %s2005_s30, 0 }
  0x16   : > { %p140_p6 = scmp.eq.s32.totalorder %s1475_s5, 1  ;;  %p1476_p8 = scmp.ge.s32.totalorder %s1923_s0, 1 }
  0x17   : > { %p2014_p7 = por %p2403_p4, %p61_p3  ;;  %p147_p10 = scmp.lt.s32.totalorder %s1923_s0, 3 }
  0x18   : > { %p2019_p9 = por %p140_p6, %p61_p3  ;;  %s1926_s9 = smov [#allocation16]  }
  0x19   : > { %s2409_s6 = scalar_select %p2014_p7, 1, 0 }
  0x1a   : > { %s2410_s7 = scalar_select %p2019_p9, 1, 0 }
  0x1b   : > { %p2024_p11 = pnand %p1476_p8, %p147_p10  ;;  %s159_s10 = sshll.u32 %s1926_s9, 4  ;;  %s160_s10 = int_to_ptr.vmem [resolvable:$true] %s159_s10 }
  0x1c   : > { %s39_s12 = sadd.s32 1, %s1919_s29  ;;  %s2413_s3 = sld [smem:[#allocation24_spill]] }
  0x1d   : > { %s2411_s8 = scalar_select %p2024_p11, 1, 0 }
  0x1e   : > { %p1637_p12 = pneg %p2024_p11 }
  0x20   : > { %p2033_p0 = pnand %p1637_p12, %p2403_p4 }
  0x22   : > { %s1743_s15 = scalar_lea.hbm %s2413_s3, 512  ;;  %p1745_p2 = pneg %p2033_p0 }
  0x23   : > { %p1744_p1 = scmp.ne.s32.totalorder %s2413_s3, %s1743_s15  ;;  %p1750_p8 = scmp.lt.u32.totalorder %s1743_s15, %s2413_s3 }
  0x25   : > { %p1746_p3 = pnand %p1745_p2, %p1744_p1 }
  0x27   : > { %p1747_p6 = pneg %p1746_p3 }
  0x29   : > { %p1752_p10 = pnand %p1750_p8, %p1747_p6 }
  0x2b   : > { %1755 = shalt.err (!%p1752_p10)
}
  0x2c   : > { %s1756_s20 = scalar_lea.vmem %s160_s10, 512  ;;  %p1764_p5 = scmp.lt.s32.totalorder %s160_s10, %s160_s10 }
  0x2d   : > { %p1757_p12 = scmp.ne.s32.totalorder %s160_s10, %s1756_s20  ;;  %p1765_p9 = scmp.lt.s32.totalorder %s1756_s20, %s1756_s20 }
  0x2f   : > { %p1759_p13 = pnand %p1757_p12, %p1745_p2  ;;  %p1766_p7 = por %p1765_p9, %p1764_p5 }
  0x31   : > { %p1760_p4 = pneg %p1759_p13 }
  0x33   : > { %p1767_p11 = pnand %p1766_p7, %p1760_p4 }
  0x35   : > { %1770 = shalt.err (!%p1767_p11)
}
  0x36   : > { %s1927_s21 = smov 128   ;;  %s1928_s22 = smov 8  }
  0x37   : > { %1640 = dma.hbm_to_vmem [thread:$0]  (!%p2033_p0), %s2413_s3, 512, %s160_s10, [#allocation15], %s1927_s21, %s1927_s21, %s1928_s22  }
  0x38   : > { %p41_p4 = scmp.ge.s32.totalorder %s39_s12, 2  ;;  %s48_s5 = sadd.s32 1, %s1911_s27 }
  0x39   : > { %p55_p5 = scmp.ne.s32.totalorder %s1911_s27, %s1907_s26  ;;  %p56_p7 = scmp.eq.s32.totalorder %s1923_s0, 0 }
  0x3a   : > { %s2433_s12 = smov (%p41_p4, %s39_s12), 0  ;;  %p2416_p11 = scmp.eq.s32.totalorder %s2005_s30, 1 }
  0x3b   : > { %2414 = sst [smem:[#allocation23_spill]] %s2433_s12  ;;  %p2060_p9 = por %p56_p7, %p55_p5 }
  0x3c   : > { %p2066_p13 = por %p2416_p11, %p55_p5  ;;  %s43_s13 = ssub.s32 %s1919_s29, %s2433_s12 }
  0x3d   : > { %p1653_p0 = scmp.lt.s32.totalorder %s1923_s0, 2  ;;  %p46_p1 = scmp.eq.s32.totalorder %s43_s13, 0 }
  0x3e   : > { %s2417_s11 = scalar_select %p2066_p13, 1, 0 }
  0x3f   : > { %s173_s10 = sand.u32 1, %s1911_s27   ;;  %s1480_s16 = sshll.u32 %s1919_s29, 7 }
  0x40   : > { %s2074_s14 = sshll.u32 %s173_s10, 3  ;;  %s2083_s19 = scalar_lea.hbm %s2399_s1, %s1480_s16 }
  0x41   : > { %s2077_s15 = scalar_select %p46_p1, %s1911_s27, %s48_s5  }
  0x42   : > { %s177_s20 = scalar_lea.vmem [#allocation11], %s2074_s14  ;;  %p2090_p2 = pnand %p1653_p0, %p2060_p9 }
  0x43   : > { %s185_s21 = sshll.u32 %s177_s20, 4  ;;  %s2097_s5 = scalar_lea.hbm %s2400_s2, %s1480_s16  ;;  %s2086_s21 = int_to_ptr.vmem [resolvable:$true] %s185_s21 }
  0x44   : > { %s192_s13 = sand.u32 1, %s1923_s0   ;;  %s174_s17 = scalar_lea.sflag [#allocation12], %s173_s10 }
  0x45   : > { %s1771_s18 = scalar_lea.hbm %s2083_s19, 128  ;;  %p1773_p6 = pneg %p2090_p2 }
  0x46   : > { %p1772_p3 = scmp.ne.s32.totalorder %s2083_s19, %s1771_s18  ;;  %s1776_s3 = scalar_lea.hbm %s2399_s1, 256 }
  0x47   : > { %p1777_p12 = scmp.lt.u32.totalorder %s2083_s19, %s2399_s1  ;;  %p1778_p4 = scmp.lt.u32.totalorder %s1776_s3, %s1771_s18 }
  0x48   : > { %p1774_p8 = pnand %p1773_p6, %p1772_p3  ;;  %p1780_p7 = scmp.lt.u32.totalorder %s1771_s18, %s2083_s19 }
  0x49   : > { %p1779_p5 = por %p1778_p4, %p1777_p12 }
  0x4a   : > { %p1775_p10 = pneg %p1774_p8 }
  0x4b   : > { %p1781_p9 = por %p1780_p7, %p1779_p5 }
  0x4d   : > { %p1782_p11 = pnand %p1781_p9, %p1775_p10 }
  0x4f   : > { %1785 = shalt.err (!%p1782_p11)
}
  0x50   : > { %s1786_s10 = scalar_lea.vmem %s2086_s21, 128  ;;  %s1929_s16 = smov [#allocation11]  }
  0x51   : > { %p1787_p0 = scmp.ne.s32.totalorder %s2086_s21, %s1786_s10  ;;  %s1791_s24 = sshll.u32 %s1929_s16, 4  ;;  %s1792_s24 = int_to_ptr.vmem [resolvable:$false] %s1791_s24 }
  0x52   : > { %s1793_s12 = scalar_lea.vmem %s1792_s24, 256  ;;  %p1794_p8 = scmp.lt.s32.totalorder %s2086_s21, %s1792_s24 }
  0x53   : > { %p1789_p1 = pnand %p1787_p0, %p1773_p6  ;;  %p1795_p12 = scmp.lt.s32.totalorder %s1793_s12, %s1786_s10 }
  0x55   : > { %p1790_p3 = pneg %p1789_p1  ;;  %p1796_p4 = por %p1795_p12, %p1794_p8 }
  0x57   : > { %p1797_p5 = pnand %p1796_p4, %p1790_p3 }
  0x59   : > { %1800 = shalt.err (!%p1797_p5)
}
  0x5a   : > { %1644 = dma.hbm_to_vmem [thread:$0]  (!%p2090_p2), %s2083_s19, 128, %s2086_s21, %s174_s17  }
  0x5b   : > { %s196_s3 = scalar_lea.vmem [#allocation14], %s2074_s14  ;;  %s193_s9 = scalar_lea.sflag [#allocation15], %s192_s13 }
  0x5c   : > { %s204_s18 = sshll.u32 %s196_s3, 4  ;;  %s1801_s20 = scalar_lea.hbm %s2097_s5, 128  ;;  %s205_s18 = int_to_ptr.vmem [resolvable:$true] %s204_s18 }
  0x5d   : > { %p1802_p10 = scmp.ne.s32.totalorder %s2097_s5, %s1801_s20  ;;  %s1806_s16 = scalar_lea.hbm %s2400_s2, 256 }
  0x5e   : > { %p1807_p11 = scmp.lt.u32.totalorder %s2097_s5, %s2400_s2  ;;  %p1808_p0 = scmp.lt.u32.totalorder %s1806_s16, %s1801_s20 }
  0x5f   : > { %p1804_p7 = pnand %p1802_p10, %p1773_p6  ;;  %p1810_p3 = scmp.lt.u32.totalorder %s1801_s20, %s2097_s5 }
  0x60   : > { %p1809_p1 = por %p1808_p0, %p1807_p11 }
  0x61   : > { %p1805_p9 = pneg %p1804_p7 }
  0x62   : > { %p1811_p8 = por %p1810_p3, %p1809_p1 }
  0x64   : > { %p1812_p12 = pnand %p1811_p8, %p1805_p9 }
  0x66   : > { %1815 = shalt.err (!%p1812_p12)
}
  0x67   : > { %s1816_s14 = scalar_lea.vmem %s205_s18, 128  ;;  %s1930_s19 = smov [#allocation14]  }
  0x68   : > { %p1817_p4 = scmp.ne.s32.totalorder %s205_s18, %s1816_s14  ;;  %s1821_s21 = sshll.u32 %s1930_s19, 4  ;;  %s1822_s21 = int_to_ptr.vmem [resolvable:$false] %s1821_s21 }
  0x69   : > { %s1823_s13 = scalar_lea.vmem %s1822_s21, 256  ;;  %p1824_p7 = scmp.lt.s32.totalorder %s205_s18, %s1822_s21 }
  0x6a   : > { %p1819_p5 = pnand %p1817_p4, %p1773_p6  ;;  %p1825_p13 = scmp.lt.s32.totalorder %s1823_s13, %s1816_s14 }
  0x6c   : > { %p1820_p10 = pneg %p1819_p5  ;;  %p1826_p0 = por %p1825_p13, %p1824_p7 }
  0x6e   : > { %p1827_p11 = pnand %p1826_p0, %p1820_p10 }
  0x70   : > { %1830 = shalt.err (!%p1827_p11)
}
  0x71   : > { %1647 = dma.hbm_to_vmem [thread:$0]  (!%p2090_p2), %s2097_s5, 128, %s205_s18, %s193_s9  }
  0x72   : > { %p2419_p9 = scmp.ne.s32.totalorder %s2411_s8, 0 }
  0x73   : > { %s2150_s17 = sand.u32 (!%p2419_p9), 1, %s1907_s26   ;;  %p2420_p6 = scmp.ne.s32.totalorder (!%p2419_p9), %s2409_s6, 0 }
  0x74   : > { %213 = sbr.rel (%p2419_p9) target bundleno = 1353 (0x549), region = 32  ;;  %s1484_s3 = sshll.u32 (!%p2419_p9), %s2150_s17, 3 }
  0x75   : > { %s216_s20 = scalar_lea.sflag (!%p2419_p9), [#allocation12], %s2150_s17  ;;  %s219_s23 = scalar_lea.vmem (!%p2419_p9), [#allocation11], %s1484_s3 }
  0x7b   : > { %1886 = dma.done.wait (%p2420_p6), %s216_s20, 128  }
  0x7c   : > { %1888 = vsyncadd (%p2420_p6), %s216_s20, 4294967168  ;;  %s224_s22 = sand.u32 1, %s2005_s30   ;;  %s228_s8 = scalar_lea.vmem [#allocation14], %s1484_s3 }
  0x7d   : > { %s225_s5 = scalar_lea.sflag [#allocation15], %s224_s22 }
  0x7e   : > { %1890 = dma.done.wait (%p2420_p6), %s225_s5, 128  }
  0x7f   : > { %1892 = vsyncadd (%p2420_p6), %s225_s5, 4294967168  ;;  %p2421_p13 = scmp.eq.s32.totalorder %s2005_s30, 0 }
  0x81   : > { %1894 = dma.done.wait (%p2421_p13), [#allocation15], 512   ;;  %p2422_p2 = pmov %p2421_p13 }
  0x82   : > { %vm281_vm0 = vcmask 261120   ;;  %v2167_v0 = vld [vmem:[%s219_s23] sm:$0xff]  ;;  %v2169_v1 = vld [vmem:[%s228_s8] sm:$0xff]  ;;  %v1931_v9 = vmov 0.0|0.0   ;;  %vm1932_vm1 = vmmov 0   ;;  %v1933_v13 = vmov 0.0  }
  0x83   : > { %1896 = vsyncadd (%p2422_p2), [#allocation15], 4294966784  ;;  %v303_v2 = vmul.f32 %v2167_v0, %v2167_v0  ;;  %v308_v3 = vmul.f32 %v2169_v1, %v2169_v1  ;;  %v379_v6 = vld [vmem:[#allocation16] sm:$0xff]  ;;  %v380_v7 = vld [vmem:[#allocation16 + $0x8] sm:$0xff]  ;;  %1585 = vmatprep.subr.bf16.mxu0 %v1931_v9  ;;  %1550 = vmatprep.mubr.msk.f32.mxu0 %vm1932_vm1, %v1933_v13  ;;  %282 = vst.msk [vmem:[#allocation4] sm:$0xff] %vm281_vm0, %v1933_v13  ;;  %s302_s30 = sld [smem:[#allocation10 + %s1915_s28]] }
  0x84   : > { %v1586_v8 = vpack.c.bf16 %v380_v7, %v379_v6  ;;  %v381_v10 = vld [vmem:[#allocation16 + $0x10] sm:$0xff]  ;;  %v382_v11 = vld [vmem:[#allocation16 + $0x18] sm:$0xff]  ;;  %283 = vst.msk [vmem:[#allocation4 + $0x8] sm:$0xff] %vm281_vm0, %v1933_v13  ;;  %284 = vst.msk [vmem:[#allocation4 + $0x10] sm:$0xff] %vm281_vm0, %v1933_v13  ;;  %v2212_v14 = vsub.f32 %v2167_v0, %v2169_v1  ;;  %v982_v15 = vadd.f32 %v2169_v1, %v2167_v0  ;;  %vm638_vm6 = vcmask 64512   ;;  %p2423_p3 = scmp.ne.s32.totalorder %s2417_s11, 0 }
  0x85   : > { %v305_v4 = vsel %vm281_vm0, %v303_v2, 0.0  ;;  %v309_v5 = vsel %vm281_vm0, %v308_v3, 0.0  ;;  %v1589_v12 = vpack.c.bf16 %v382_v11, %v381_v10  ;;  %285 = vst.msk [vmem:[#allocation4 + $0x18] sm:$0xff] %vm281_vm0, %v1933_v13  ;;  %286 = vst.msk [vmem:[#allocation5] sm:$0xff] %vm281_vm0, %v1933_v13  ;;  %v312_v16 = vmul.f32 %v2169_v1, %v2167_v0 }
  0x86   : > { %306 = vadd.xlane.f32.xlu0 %v305_v4  ;;  %1587 = vmatpush3.bf16.msra.mxu0 %v1586_v8  ;;  %287 = vst.msk [vmem:[#allocation5 + $0x8] sm:$0xff] %vm281_vm0, %v1933_v13  ;;  %288 = vst.msk [vmem:[#allocation5 + $0x10] sm:$0xff] %vm281_vm0, %v1933_v13  ;;  %vm331_vm9 = vcmask 7168   ;;  %vm279_vm10 = vcmask 253952   ;;  %vm591_vm11 = vcmask 261127   ;;  %vm537_vm12 = vcmask 260096  }
  0x87   : > { %1588 = vmatprep.subr.bf16.mxu0 %v1931_v9  ;;  %289 = vst.msk [vmem:[#allocation5 + $0x18] sm:$0xff] %vm281_vm0, %v1933_v13  ;;  %290 = vst.msk [vmem:[#allocation6] sm:$0xff] %vm281_vm0, %v1933_v13  ;;  %v313_v17 = vsel %vm281_vm0, %v312_v16, 0.0 }
  0x88   : > { %291 = vst.msk [vmem:[#allocation6 + $0x8] sm:$0xff] %vm281_vm0, %v1933_v13  ;;  %292 = vst.msk [vmem:[#allocation6 + $0x10] sm:$0xff] %vm281_vm0, %v1933_v13 }
  0x89   : > { %293 = vst.msk [vmem:[#allocation6 + $0x18] sm:$0xff] %vm281_vm0, %v1933_v13  ;;  %294 = vst.msk [vmem:[#allocation7] sm:$0xff] %vm281_vm0, %v1933_v13  ;;  %v316_v39 = vstv %s302_s30 }
  0x8a   : > { %310 = vadd.xlane.f32.xlu0 %v309_v5  ;;  %295 = vst.msk [vmem:[#allocation7 + $0x8] sm:$0xff] %vm281_vm0, %v1933_v13  ;;  %296 = vst.msk [vmem:[#allocation7 + $0x10] sm:$0xff] %vm281_vm0, %v1933_v13  ;;  %1590 = vmatpush3.bf16.msra.mxu0 %v1589_v12  ;;  %v317_v40 = vmul.f32 %v316_v39, %v2169_v1 }
  0x8b   : > { %297 = vst.msk [vmem:[#allocation7 + $0x18] sm:$0xff] %vm281_vm0, %v1933_v13 }
  0x8c   : > { %v318_v41 = vsub.f32 %v2167_v0, %v317_v40  ;;  %298 = vst.msk [vmem:[#allocation8] sm:$0x1] %vm279_vm10, %v1933_v13  ;;  %299 = vst.msk [vmem:[#allocation8 + $0x1] sm:$0x1] %vm279_vm10, %v1933_v13 }
  0x8d   : > { %1551 = vmatmul.mubr.msk.f32.vlgmr.msra.gmra.mrb[0].mxu0 %vm281_vm0, %v2212_v14  ;;  %280 = vst.msk [vmem:[#allocation3] sm:$0x1] %vm279_vm10, %v1933_v13 }
  0x8e   : > { %v320_v42 = vmul.f32 %v318_v41, %v318_v41 }
  0x8f   : > { %v886_v39 = vld [vmem:[#allocation6 + $0x8] sm:$0xff] }
  0x90   : > { %v321_v43 = vsel %vm281_vm0, %v320_v42, 0.0 }
  0x93   : > { %v484_v10 = vld [vmem:[#allocation8] sm:$0x1]  ;;  %v487_v11 = vld [vmem:[#allocation8 + $0x1] sm:$0x1] }
  0x94   : > { %v485_v12 = vsub.f32 %v2167_v0, %v484_v10  ;;  %592 = vst.msk [vmem:[#allocation8 - $0x7] sm:$0x80] %vm591_vm11, %v2167_v0  ;;  %593 = vst.msk [vmem:[#allocation8 - $0x6] sm:$0x80] %vm591_vm11, %v2169_v1 }
  0xb7   : > { %987 = vxpose.xlu0.b32.start.end [1/1] (short) (narrow) %v982_v15, 32  ;;  %v488_v15 = vsub.f32 %v2169_v1, %v487_v11 }
  0xb9   : > { %v489_v16 = vmul.f32 %v488_v15, %v485_v12 }
  0xf0   : > { %314 = vadd.xlane.f32.xlu0 %v313_v17  ;;  %v490_v17 = vsel %vm279_vm10, %v489_v16, 0.0 }
 0x113   : > { %v307_v18 = vpop.xlane.xlu0 %306 }
 0x114   : > { %1713 = vrsqrt.f32 %v307_v18  ;;  %v594_v19 = vmax.f32 %v307_v18, 1e-24  ;;  %vm347_vm2 = vcmp.eq.f32.partialorder %v307_v18, inf  ;;  %v350_v28 = vand.u32 2147483648, %v307_v18 }
 0x115   : > { %vm349_vm4 = vcmp.eq.f32.partialorder %v307_v18, 0.0 }
 0x117   : > { %v311_v20 = vpop.xlane.xlu0 %310 }
 0x118   : > { %1715 = vrsqrt.f32 %v311_v20  ;;  %v597_v21 = vmax.f32 %v311_v20, 1e-24  ;;  %vm354_vm3 = vcmp.eq.f32.partialorder %v311_v20, inf  ;;  %v357_v29 = vand.u32 2147483648, %v311_v20 }
 0x119   : > { %1717 = vrsqrt.f32 %v594_v19  ;;  %vm356_vm5 = vcmp.eq.f32.partialorder %v311_v20, 0.0 }
 0x11a   : > { %1719 = vrsqrt.f32 %v597_v21  ;;  %v513_v21 = vmul.f32 %v488_v15, %v488_v15 }
 0x11e   : > { %v1714_v22 = vpop.eup %1713 }
 0x11f   : > { %v346_v23 = vmul.f32 %v1714_v22, %v307_v18  ;;  %v514_v22 = vsel %vm279_vm10, %v513_v21, 0.0 }
 0x121   : > { %v348_v26 = vsel %vm347_vm2, %v307_v18, %v346_v23  ;;  %v501_v18 = vmul.f32 %v485_v12, %v485_v12 }
 0x122   : > { %v1716_v24 = vpop.eup %1715  ;;  %v351_v34 = vsel %vm349_vm4, %v350_v28, %v348_v26 }
 0x123   : > { %v1718_v25 = vpop.eup %1717  ;;  %v353_v27 = vmul.f32 %v1716_v24, %v311_v20  ;;  %v502_v19 = vsel %vm279_vm10, %v501_v18, 0.0  ;;  %v530_v24 = vrot.slane %v2169_v1, 7 }
 0x124   : > { %v1720_v30 = vpop.eup %1719  ;;  %v596_v32 = vmul.f32 %v1718_v25, %v2167_v0 }
 0x125   : > { %v355_v31 = vsel %vm354_vm3, %v311_v20, %v353_v27  ;;  %v599_v33 = vmul.f32 %v1720_v30, %v2169_v1  ;;  %v526_v20 = vrot.slane %v2167_v0, 7  ;;  %v532_v26 = vsub.f32 %v2169_v1, %v530_v24  ;;  %v885_v1 = vld [vmem:[#allocation6] sm:$0xff] }
 0x126   : > { %v358_v35 = vsel %vm356_vm5, %v357_v29, %v355_v31 }
 0x127   : > { %v359_v36 = vmul.f32 %v358_v35, %v351_v34  ;;  %v600_v37 = vadd.f32 %v599_v33, %v596_v32  ;;  %v601_v38 = vsub.f32 %v596_v32, %v599_v33  ;;  %v528_v13 = vsub.f32 %v2167_v0, %v526_v20  ;;  %v603_v0 = vld [vmem:[#allocation4 + $0x8] sm:$0xff]  ;;  %v602_v34 = vld [vmem:[#allocation4] sm:$0xff] }
 0x128   : > { %v564_v28 = vmul.f32 %v532_v26, %v532_v26 }
 0x129   : > { %606 = vxpose.xlu1.b32.start.end [1/1] (short) (narrow) %v600_v37, 32  ;;  %1553 = vmatprep.subr.mxu0 %v600_v37  ;;  %v360_v58 = vmax.f32 %v359_v36, 1e-08  ;;  %v549_v23 = vmul.f32 %v528_v13, %v528_v13  ;;  %v533_v31 = vmul.f32 %v532_v26, %v528_v13 }
 0x12a   : > { %1591 = vmatprep.subr.mxu1 %v600_v37  ;;  %1554 = vmatpush3.msra.mxu0 %v600_v37  ;;  %v566_v29 = vrot.slane %v564_v28, 1 }
 0x12b   : > { %1592 = vmatpush3.msra.mxu1 %v600_v37  ;;  %1569 = vmatprep.subr.mxu0 %v601_v38  ;;  %1721 = vrcp.f32 %v360_v58  ;;  %v551_v25 = vrot.slane %v549_v23, 1  ;;  %v535_v32 = vrot.slane %v533_v31, 1  ;;  %v744_v58 = vld [vmem:[#allocation5] sm:$0xff] }
 0x12c   : > { %1561 = vmatprep.subr.mxu1 %v601_v38  ;;  %v568_v30 = vsel %vm537_vm12, %v566_v29, 0.0 }
 0x12d   : > { %v553_v27 = vsel %vm537_vm12, %v551_v25, 0.0  ;;  %v2262_v33 = vsel %vm537_vm12, %v535_v32, 0.0 }
 0x135   : > { %v1722_v61 = vpop.eup %1721 }
 0x136   : > { %748 = vxpose.xlu1.b32.start.end [1/1] (short) (narrow) %v601_v38, 32 }
 0x137   : > { %v1003_v51 = vpop.trf.xlu0 }
 0x13b   : > { %v1004_v53 = vpop.trf.xlu0 }
 0x13f   : > { %v1005_v56 = vpop.trf.xlu0 }
 0x143   : > { %v1006_v57 = vpop.trf.xlu0 }
 0x160   : > { %v452_v44 = vpop.f32.mrb[0].mxu0 }
 0x161   : > { %v1552_v45 = vpop.f32.mrb[1].mxu0  ;;  %v457_v9 = vmul.f32 %v452_v44, %v452_v44  ;;  %v605_v44 = vld [vmem:[#allocation4 + $0x18] sm:$0xff] }
 0x162   : > { %v888_v45 = vld [vmem:[#allocation6 + $0x18] sm:$0xff] }
 0x169   : > { %322 = vadd.xlane.f32.xlu1 %v321_v43 }
 0x17d   : > { %v315_v60 = vpop.xlane.xlu0 %314 }
 0x17e   : > { %v363_v2 = vmul.f32 %v1722_v61, %v315_v60 }
 0x180   : > { %v364_v6 = vsub.f32 1.0, %v363_v2 }
 0x182   : > { %v365_v8 = vsel %vm331_vm9, %v364_v6, 0.0  ;;  %v747_v6 = vld [vmem:[#allocation5 + $0x18] sm:$0xff] }
 0x1a9   : > { %v622_v46 = vpop.trf.xlu1 }
 0x1aa   : > { %1555 = vmatprep.mubr.msk.f32.mxu0 %vm638_vm6, %v622_v46 }
 0x1ad   : > { %v623_v47 = vpop.trf.xlu1 }
 0x1ae   : > { %1556 = vmatmul.mubr.msk.f32.vlgmr.msra.gmra.mrb[2].mxu0 %vm638_vm6, %v623_v47 }
 0x1af   : > { %1570 = vmatpush3.msra.mxu0 %v601_v38  ;;  %1571 = vmatprep.mubr.msk.f32.mxu0 %vm638_vm6, %v622_v46  ;;  %v604_v46 = vld [vmem:[#allocation4 + $0x10] sm:$0xff] }
 0x1b1   : > { %v624_v48 = vpop.trf.xlu1 }
 0x1b2   : > { %1572 = vmatmul.mubr.msk.f32.vlgmr.msra.gmra.mrb[4].mxu0 %vm638_vm6, %v623_v47  ;;  %1558 = vmatprep.mubr.msk.f32.mxu1 %vm638_vm6, %v624_v48  ;;  %v887_v47 = vld [vmem:[#allocation6 + $0x10] sm:$0xff] }
 0x1b3   : > { %1574 = vmatprep.mubr.msk.f32.mxu0 %vm638_vm6, %v624_v48 }
 0x1b5   : > { %v625_v49 = vpop.trf.xlu1 }
 0x1b6   : > { %1559 = vmatmul.mubr.msk.f32.vlgmr.msra.gmra.mrb[0].mxu1 %vm638_vm6, %v625_v49  ;;  %1575 = vmatmul.mubr.msk.f32.gmra.mrb[6].mxu0 %vm638_vm6, %v625_v49 }
 0x1b7   : > { %1562 = vmatpush3.msra.mxu1 %v601_v38 }
 0x1b8   : > { %1577 = vmatprep.subr.mxu1 %v2212_v14 }
 0x1b9   : > { %v764_v50 = vpop.trf.xlu1 }
 0x1ba   : > { %1563 = vmatprep.mubr.msk.f32.mxu1 %vm638_vm6, %v764_v50 }
 0x1bd   : > { %v765_v52 = vpop.trf.xlu1 }
 0x1be   : > { %1564 = vmatmul.mubr.msk.f32.vlgmr.msra.gmra.mrb[2].mxu1 %vm638_vm6, %v765_v52 }
 0x1bf   : > { %1578 = vmatpush3.msra.mxu1 %v2212_v14 }
 0x1c1   : > { %v766_v54 = vpop.trf.xlu1 }
 0x1c2   : > { %1566 = vmatprep.mubr.msk.f32.mxu1 %vm638_vm6, %v766_v54 }
 0x1c5   : > { %v767_v55 = vpop.trf.xlu1 }
 0x1c6   : > { %1567 = vmatmul.mubr.msk.f32.gmra.mrb[4].mxu1 %vm638_vm6, %v767_v55 }
 0x1c7   : > { %1579 = vmatprep.mubr.msk.f32.mxu1 %vm638_vm6, %v1003_v51 }
 0x1ca   : > { %1580 = vmatmul.mubr.msk.f32.vlgmr.msra.gmra.mrb[6].mxu1 %vm638_vm6, %v1004_v53 }
 0x1cb   : > { %1582 = vmatprep.mubr.msk.f32.mxu1 %vm638_vm6, %v1005_v56  ;;  %v745_v56 = vld [vmem:[#allocation5 + $0x8] sm:$0xff] }
 0x1ce   : > { %1583 = vmatmul.mubr.msk.f32.gmra.mrb[8].mxu1 %vm638_vm6, %v1006_v57 }
 0x1f6   : > { %v323_v59 = vpop.xlane.xlu1 %322 }
 0x1f7   : > { %1723 = vrsqrt.f32 %v323_v59  ;;  %vm326_vm7 = vcmp.eq.f32.partialorder %v323_v59, inf  ;;  %v329_v63 = vand.u32 2147483648, %v323_v59  ;;  %vm328_vm8 = vcmp.eq.f32.partialorder %v323_v59, 0.0 }
 0x201   : > { %v1724_v62 = vpop.eup %1723 }
 0x202   : > { %v325_v3 = vmul.f32 %v1724_v62, %v323_v59 }
 0x204   : > { %v327_v4 = vsel %vm326_vm7, %v323_v59, %v325_v3 }
 0x205   : > { %v330_v5 = vsel %vm328_vm8, %v329_v63, %v327_v4 }
 0x206   : > { %v332_v7 = vsel %vm331_vm9, %v330_v5, 0.0 }
 0x207   : > { %333 = vadd.xlane.f32.xlu0 %v332_v7 }
 0x20b   : > { %366 = vadd.xlane.f32.xlu0 %v365_v8  ;;  %v746_v8 = vld [vmem:[#allocation5 + $0x10] sm:$0xff] }
 0x20f   : > { %458 = vadd.xlane.f32.xlu0 %v457_v9 }
 0x213   : > { %491 = vadd.xlane.f32.xlu0 %v490_v17 }
 0x217   : > { %503 = vadd.xlane.f32.xlu0 %v502_v19 }
 0x21b   : > { %515 = vadd.xlane.f32.xlu0 %v514_v22 }
 0x21f   : > { %554 = vadd.xlane.f32.xlu0 %v553_v27 }
 0x223   : > { %569 = vadd.xlane.f32.xlu0 %v568_v30 }
 0x281   : > { %v1557_v35 = vpop.f32.mrb[2].mxu0 }
 0x282   : > { %v737_v36 = vadd.f32 %v1557_v35, %v603_v0  ;;  %v717_v37 = vpop.f32.mrb[3].mxu0 }
 0x283   : > { %v736_v38 = vadd.f32 %v717_v37, %v602_v34 }
 0x284   : > { %741 = vst.msk [vmem:[#allocation4 + $0x8] sm:$0xff] %vm281_vm0, %v737_v36 }
 0x285   : > { %740 = vst.msk [vmem:[#allocation4] sm:$0xff] %vm281_vm0, %v736_v38  ;;  %v1573_v40 = vpop.f32.mrb[4].mxu0 }
 0x286   : > { %v975_v41 = vadd.f32 %v1573_v40, %v886_v39  ;;  %v955_v42 = vpop.f32.mrb[5].mxu0 }
 0x287   : > { %v974_v43 = vadd.f32 %v955_v42, %v885_v1 }
 0x288   : > { %979 = vst.msk [vmem:[#allocation6 + $0x8] sm:$0xff] %vm281_vm0, %v975_v41 }
 0x289   : > { %978 = vst.msk [vmem:[#allocation6] sm:$0xff] %vm281_vm0, %v974_v43  ;;  %v1560_v48 = vpop.f32.mrb[0].mxu1  ;;  %v1576_v49 = vpop.f32.mrb[6].mxu0 }
 0x28a   : > { %v739_v50 = vadd.f32 %v1560_v48, %v605_v44  ;;  %v977_v51 = vadd.f32 %v1576_v49, %v888_v45  ;;  %v727_v52 = vpop.f32.mrb[1].mxu1  ;;  %v965_v53 = vpop.f32.mrb[7].mxu0 }
 0x28b   : > { %v738_v54 = vadd.f32 %v727_v52, %v604_v46  ;;  %v976_v55 = vadd.f32 %v965_v53, %v887_v47  ;;  %v1128_v24 = vld [vmem:[#allocation4 + $0x8] sm:$0xff]  ;;  %v983_v52 = vld [vmem:[#allocation7] sm:$0xff]  ;;  %v986_v53 = vld [vmem:[#allocation7 + $0x18] sm:$0xff] }
 0x28c   : > { %743 = vst.msk [vmem:[#allocation4 + $0x18] sm:$0xff] %vm281_vm0, %v739_v50  ;;  %981 = vst.msk [vmem:[#allocation6 + $0x18] sm:$0xff] %vm281_vm0, %v977_v51  ;;  %v1127_v26 = vld [vmem:[#allocation4] sm:$0xff]  ;;  %v984_v50 = vld [vmem:[#allocation7 + $0x8] sm:$0xff] }
 0x28d   : > { %742 = vst.msk [vmem:[#allocation4 + $0x10] sm:$0xff] %vm281_vm0, %v738_v54  ;;  %980 = vst.msk [vmem:[#allocation6 + $0x10] sm:$0xff] %vm281_vm0, %v976_v55 }
 0x28f   : > { %v2276_v2 = vld [vmem:[#allocation6 + $0x8] sm:$0xff] }
 0x290   : > { %v2272_v57 = vld [vmem:[#allocation6] sm:$0xff] }
 0x291   : > { %v1565_v59 = vpop.f32.mrb[2].mxu1  ;;  %1159 = vxpose.xlu1.b32.start [1/4] (short) (narrow) %v2272_v57, 32 }
 0x292   : > { %v878_v60 = vadd.f32 %v1565_v59, %v745_v56  ;;  %v858_v61 = vpop.f32.mrb[3].mxu1  ;;  %v985_v56 = vld [vmem:[#allocation7 + $0x10] sm:$0xff] }
 0x293   : > { %v877_v62 = vadd.f32 %v858_v61, %v744_v58  ;;  %v2284_v20 = vld [vmem:[#allocation6 + $0x18] sm:$0xff] }
 0x294   : > { %882 = vst.msk [vmem:[#allocation5 + $0x8] sm:$0xff] %vm281_vm0, %v878_v60  ;;  %v334_v63 = vpop.xlane.xlu0 %333  ;;  %v2280_v4 = vld [vmem:[#allocation6 + $0x10] sm:$0xff]  ;;  %v1130_v1 = vld [vmem:[#allocation4 + $0x18] sm:$0xff] }
 0x295   : > { %881 = vst.msk [vmem:[#allocation5] sm:$0xff] %vm281_vm0, %v877_v62  ;;  %v335_v3 = vrot.slane %v334_v63, 4  ;;  %1160 = vxpose.xlu1.b32.cont [2/4] (short) (narrow) %v2276_v2, 32  ;;  %v1129_v39 = vld [vmem:[#allocation4 + $0x10] sm:$0xff] }
 0x297   : > { %v336_v5 = vadd.f32 %v335_v3, %v334_v63 }
 0x298   : > { %v367_v7 = vpop.xlane.xlu0 %366 }
 0x299   : > { %v337_v9 = vrot.slane %v336_v5, 2  ;;  %v368_v10 = vrot.slane %v367_v7, 4  ;;  %v1568_v11 = vpop.f32.mrb[4].mxu1  ;;  %1161 = vxpose.xlu1.b32.cont [3/4] (short) (narrow) %v2280_v4, 32 }
 0x29a   : > { %v880_v12 = vadd.f32 %v1568_v11, %v747_v6  ;;  %v868_v15 = vpop.f32.mrb[5].mxu1 }
 0x29b   : > { %v369_v16 = vadd.f32 %v368_v10, %v367_v7  ;;  %v879_v17 = vadd.f32 %v868_v15, %v746_v8  ;;  %v338_v18 = vadd.f32 %v337_v9, %v336_v5  ;;  %v1132_v19 = vld [vmem:[#allocation5 + $0x8] sm:$0xff]  ;;  %v1329_v5 = vlaneseq }
 0x29c   : > { %884 = vst.msk [vmem:[#allocation5 + $0x18] sm:$0xff] %vm281_vm0, %v880_v12  ;;  %v1131_v21 = vld [vmem:[#allocation5] sm:$0xff]  ;;  %v459_v13 = vpop.xlane.xlu0 %458  ;;  %v1140_v27 = vmul.f32 %v1132_v19, %v1128_v24 }
 0x29d   : > { %v370_v22 = vrot.slane %v369_v16, 2  ;;  %883 = vst.msk [vmem:[#allocation5 + $0x10] sm:$0xff] %vm281_vm0, %v879_v17  ;;  %1162 = vxpose.xlu1.b32.end [4/4] (short) (narrow) %v2284_v20, 32  ;;  %v339_v23 = vrot.slane %v338_v18, 1  ;;  %v460_v25 = vrot.slane %v459_v13, 4  ;;  %v1139_v30 = vmul.f32 %v1131_v21, %v1127_v26  ;;  %v1581_v51 = vpop.f32.mrb[6].mxu1 }
 0x29e   : > { %v1144_v37 = vsel %vm281_vm0, %v1140_v27, 0.0  ;;  %v1117_v54 = vadd.f32 %v1581_v51, %v984_v50  ;;  %v1097_v55 = vpop.f32.mrb[7].mxu1  ;;  %v2297_v10 = vand.u32 127, %v1329_v5 }
 0x29f   : > { %v340_v28 = vadd.f32 %v339_v23, %v338_v18  ;;  %v371_v29 = vadd.f32 %v370_v22, %v369_v16  ;;  %v461_v31 = vadd.f32 %v460_v25, %v459_v13  ;;  %v1143_v36 = vsel %vm281_vm0, %v1139_v30, 0.0 }
 0x2a0   : > { %v1145_v44 = vadd.f32 %v1144_v37, %v1143_v36  ;;  %v492_v58 = vpop.xlane.xlu0 %491  ;;  %v1116_v59 = vadd.f32 %v1097_v55, %v983_v52  ;;  %1121 = vst.msk [vmem:[#allocation7 + $0x8] sm:$0xff] %vm281_vm0, %v1117_v54  ;;  %vm1331_vm13 = vcmp.eq.s32.totalorder %v2297_v10, 0  ;;  %vm1334_vm14 = vcmp.eq.s32.totalorder %v2297_v10, 1 }
 0x2a1   : > { %1593 = vpush %v340_v28  ;;  %v372_v32 = vrot.slane %v371_v29, 1  ;;  %v462_v0 = vrot.slane %v461_v31, 2  ;;  %v1584_v60 = vpop.f32.mrb[8].mxu1  ;;  %v493_v7 = vrot.slane %v492_v58, 4  ;;  %vm1337_vm1 = vcmp.eq.s32.totalorder %v2297_v10, 2 }
 0x2a2   : > { %v1119_v61 = vadd.f32 %v1584_v60, %v986_v53  ;;  %v1107_v62 = vpop.f32.mrb[9].mxu1  ;;  %1120 = vst.msk [vmem:[#allocation7] sm:$0xff] %vm281_vm0, %v1116_v59  ;;  %vm1340_vm2 = vcmp.eq.s32.totalorder %v2297_v10, 3  ;;  %vm1343_vm7 = vcmp.eq.s32.totalorder %v2297_v10, 4  ;;  %vm1346_vm8 = vcmp.eq.s32.totalorder %v2297_v10, 5 }
 0x2a3   : > { %v373_v34 = vadd.f32 %v372_v32, %v371_v29  ;;  %v1134_v35 = vld [vmem:[#allocation5 + $0x18] sm:$0xff]  ;;  %v463_v38 = vadd.f32 %v462_v0, %v461_v31  ;;  %v1118_v63 = vadd.f32 %v1107_v62, %v985_v56  ;;  %v494_v11 = vadd.f32 %v493_v7, %v492_v58 }
 0x2a4   : > { %v1133_v40 = vld [vmem:[#allocation5 + $0x10] sm:$0xff]  ;;  %v1142_v42 = vmul.f32 %v1134_v35, %v1130_v1  ;;  %1123 = vst.msk [vmem:[#allocation7 + $0x18] sm:$0xff] %vm281_vm0, %v1119_v61  ;;  %v504_v3 = vpop.xlane.xlu0 %503  ;;  %vm1349_vm9 = vcmp.eq.s32.totalorder %v2297_v10, 6 }
 0x2a5   : > { %1595 = vpush %v373_v34  ;;  %v1141_v41 = vmul.f32 %v1133_v40, %v1129_v39  ;;  %v464_v43 = vrot.slane %v463_v38, 1  ;;  %v505_v8 = vrot.slane %v504_v3, 4  ;;  %v495_v17 = vrot.slane %v494_v11, 2 }
 0x2a6   : > { %v1148_v48 = vsel %vm281_vm0, %v1142_v42, 0.0  ;;  %1122 = vst.msk [vmem:[#allocation7 + $0x10] sm:$0xff] %vm281_vm0, %v1118_v63 }
 0x2a7   : > { %v1146_v45 = vsel %vm281_vm0, %v1141_v41, 0.0  ;;  %v465_v46 = vadd.f32 %v464_v43, %v463_v38  ;;  %v506_v12 = vadd.f32 %v505_v8, %v504_v3  ;;  %v496_v22 = vadd.f32 %v495_v17, %v494_v11  ;;  %v1224_v56 = vld [vmem:[#allocation7 + $0x8] sm:$0xff] }
 0x2a8   : > { %v1147_v47 = vadd.f32 %v1146_v45, %v1145_v44  ;;  %v516_v6 = vpop.xlane.xlu0 %515 }
 0x2a9   : > { %1597 = vpush %v465_v46  ;;  %v517_v9 = vrot.slane %v516_v6, 4  ;;  %v507_v18 = vrot.slane %v506_v12, 2  ;;  %v497_v25 = vrot.slane %v496_v22, 1  ;;  %v2311_v50 = vld [vmem:[#allocation7] sm:$0xff] }
 0x2aa   : > { %v1149_v49 = vadd.f32 %v1148_v48, %v1147_v47 }
 0x2ab   : > { %v518_v15 = vadd.f32 %v517_v9, %v516_v6  ;;  %v508_v23 = vadd.f32 %v507_v18, %v506_v12  ;;  %v498_v28 = vadd.f32 %v497_v25, %v496_v22  ;;  %v1226_v8 = vld [vmem:[#allocation7 + $0x18] sm:$0xff] }
 0x2ac   : > { %1150 = vadd.xlane.f32.xlu0 %v1149_v49 }
 0x2ad   : > { %v519_v19 = vrot.slane %v518_v15, 2  ;;  %v509_v26 = vrot.slane %v508_v23, 1  ;;  %1599 = vpush %v498_v28  ;;  %v1225_v61 = vld [vmem:[#allocation7 + $0x10] sm:$0xff] }
 0x2af   : > { %v520_v24 = vadd.f32 %v519_v19, %v518_v15  ;;  %v510_v29 = vadd.f32 %v509_v26, %v508_v23 }
 0x2b1   : > { %v521_v27 = vrot.slane %v520_v24, 1  ;;  %1601 = vpush %v510_v29 }
 0x2b3   : > { %v522_v30 = vadd.f32 %v521_v27, %v520_v24  ;;  %v470_v24 = vld [vmem:[#allocation3] sm:$0x1] }
 0x2b5   : > { %1603 = vpush %v522_v30 }
 0x2c4   : > { %539 = vadd.xlane.f32.xlu1 %v2262_v33 }
 0x2d2   : > { %s1594_s6 = spop %1593 }
 0x2d3   : > { %v1332_v16 = vstv %s1594_s6 }
 0x2d4   : > { %v1333_v33 = vsel %vm1331_vm13, %v1332_v16, 0.0 }
 0x2d6   : > { %s1596_s18 = spop %1595 }
 0x2d7   : > { %v1335_v21 = vstv %s1596_s18 }
 0x2d8   : > { %v2301_v13 = vsel %vm1334_vm14, %v1335_v21, %v1333_v33  ;;  %v471_v33 = vsel %vm281_vm0, %v2212_v14, 0.0 }
 0x2d9   : > { %v472_v17 = vrot.slane %v471_v33, 4 }
 0x2da   : > { %s2317_s9 = spop %1597 }
 0x2db   : > { %v473_v18 = vadd.f32 %v472_v17, %v471_v33 }
 0x2dd   : > { %v474_v19 = vrot.slane %v473_v18, 2 }
 0x2de   : > { %s1600_s10 = spop %1599 }
 0x2df   : > { %v475_v21 = vadd.f32 %v474_v19, %v473_v18  ;;  %s500_s24 = smul.f32 0.0, %s1600_s10  ;;  %s1934_s10 = smov 0.0  }
 0x2e1   : > { %v476_v22 = vrot.slane %v475_v21, 1 }
 0x2e2   : > { %s1602_s16 = spop %1601 }
 0x2e3   : > { %v477_v23 = vadd.f32 %v476_v22, %v475_v21  ;;  %s512_s12 = smul.f32 0.0, %s1602_s16 }
 0x2e5   : > { %v478_v25 = vadd.f32 %v477_v23, %v470_v24 }
 0x2e6   : > { %s1604_s14 = spop %1603 }
 0x2e7   : > { %480 = vst.msk [vmem:[#allocation3] sm:$0x1] %vm279_vm10, %v478_v25  ;;  %s524_s19 = smul.f32 0.0, %s1604_s14 }
 0x311   : > { %v1175_v31 = vpop.trf.xlu1 }
 0x312   : > { %v1191_v34 = vmul.f32 %v1175_v31, %v2272_v57 }
 0x314   : > { %v1195_v38 = vsel %vm281_vm0, %v1191_v34, 0.0 }
 0x315   : > { %v1176_v32 = vpop.trf.xlu1 }
 0x316   : > { %v1192_v0 = vmul.f32 %v1176_v32, %v2276_v2  ;;  %v555_v2 = vpop.xlane.xlu0 %554 }
 0x317   : > { %v556_v45 = vrot.slane %v555_v2, 4 }
 0x318   : > { %v1196_v36 = vsel %vm281_vm0, %v1192_v0, 0.0 }
 0x319   : > { %v1177_v35 = vpop.trf.xlu1  ;;  %v1197_v1 = vadd.f32 %v1196_v36, %v1195_v38  ;;  %v557_v48 = vadd.f32 %v556_v45, %v555_v2 }
 0x31a   : > { %v1193_v37 = vmul.f32 %v1177_v35, %v2280_v4  ;;  %v570_v57 = vpop.xlane.xlu0 %569 }
 0x31b   : > { %v571_v46 = vrot.slane %v570_v57, 4  ;;  %v558_v51 = vrot.slane %v557_v48, 2 }
 0x31c   : > { %v1198_v39 = vsel %vm281_vm0, %v1193_v37, 0.0 }
 0x31d   : > { %v1178_v40 = vpop.trf.xlu1  ;;  %v1199_v42 = vadd.f32 %v1198_v39, %v1197_v1  ;;  %v572_v49 = vadd.f32 %v571_v46, %v570_v57  ;;  %v559_v58 = vadd.f32 %v558_v51, %v557_v48  ;;  %v1294_v1 = vld [vmem:[#allocation3] sm:$0x1] }
 0x31e   : > { %v1194_v41 = vmul.f32 %v1178_v40, %v2284_v20  ;;  %v1295_v57 = vmul.f32 0.125, %v1294_v1 }
 0x31f   : > { %v573_v53 = vrot.slane %v572_v49, 2  ;;  %v560_v63 = vrot.slane %v559_v58, 1 }
 0x320   : > { %v1200_v43 = vsel %vm281_vm0, %v1194_v41, 0.0 }
 0x321   : > { %v1201_v44 = vadd.f32 %v1200_v43, %v1199_v42  ;;  %v574_v60 = vadd.f32 %v573_v53, %v572_v49  ;;  %v561_v9 = vadd.f32 %v560_v63, %v559_v58  ;;  %v1341_v58 = vstv %s2317_s9 }
 0x323   : > { %1202 = vadd.xlane.f32.xlu0 %v1201_v44  ;;  %v575_v6 = vrot.slane %v574_v60, 1 }
 0x325   : > { %v576_v15 = vadd.f32 %v575_v6, %v574_v60 }
 0x339   : > { %v1151_v47 = vpop.xlane.xlu0 %1150 }
 0x33a   : > { %v1152_v4 = vrot.slane %v1151_v47, 4 }
 0x33c   : > { %v1153_v52 = vadd.f32 %v1152_v4, %v1151_v47  ;;  %v1296_v4 = vmul.f32 %v1295_v57, %v1295_v57 }
 0x33e   : > { %v1154_v55 = vrot.slane %v1153_v52, 2 }
 0x340   : > { %v1155_v3 = vadd.f32 %v1154_v55, %v1153_v52 }
 0x342   : > { %v1156_v11 = vrot.slane %v1155_v3, 1 }
 0x344   : > { %v1157_v16 = vadd.f32 %v1156_v11, %v1155_v3 }
 0x350   : > { %1227 = vxpose.xlu0.b32.start [1/4] (short) (narrow) %v2311_v50, 32 }
 0x351   : > { %v540_v20 = vpop.xlane.xlu1 %539 }
 0x352   : > { %v541_v54 = vrot.slane %v540_v20, 4 }
 0x354   : > { %v542_v59 = vadd.f32 %v541_v54, %v540_v20  ;;  %1228 = vxpose.xlu0.b32.cont [2/4] (short) (narrow) %v1224_v56, 32 }
 0x356   : > { %v543_v62 = vrot.slane %v542_v59, 2 }
 0x358   : > { %1229 = vxpose.xlu0.b32.cont [3/4] (short) (narrow) %v1225_v61, 32  ;;  %v544_v5 = vadd.f32 %v543_v62, %v542_v59 }
 0x35a   : > { %v545_v7 = vrot.slane %v544_v5, 1 }
 0x35c   : > { %1230 = vxpose.xlu0.b32.end [4/4] (short) (narrow) %v1226_v8, 32  ;;  %v546_v12 = vadd.f32 %v545_v7, %v544_v5 }
 0x35e   : > { %1605 = vpush %v546_v12 }
 0x35f   : > { %1607 = vpush %v561_v9 }
 0x360   : > { %1609 = vpush %v576_v15 }
 0x361   : > { %1611 = vpush %v1157_v16 }
 0x38f   : > { %s1606_s21 = spop %1605 }
 0x390   : > { %s2319_s13 = sadd.f32 %s1606_s21, %s500_s24  ;;  %s1608_s3 = spop %1607 }
 0x391   : > { %s2321_s20 = sadd.f32 %s1608_s3, %s512_s12  ;;  %s1610_s23 = spop %1609 }
 0x392   : > { %s2323_s22 = sadd.f32 %s1610_s23, %s524_s19  ;;  %s1612_s8 = spop %1611 }
 0x393   : > { %s1935_s21 = smov 1e-08  }
 0x394   : > { %s1310_s5 = smul.f32 %s2323_s22, %s2321_s20 }
 0x396   : > { %v1311_v9 = vstv %s1310_s5 }
 0x397   : > { %vm1314_vm3 = vcmp.eq.f32.partialorder %v1311_v9, inf  ;;  %v1317_v23 = vand.u32 2147483648, %v1311_v9  ;;  %vm1316_vm6 = vcmp.eq.f32.partialorder %v1311_v9, 0.0 }
 0x3b0   : > { %v1203_v14 = vpop.xlane.xlu0 %1202 }
 0x3b1   : > { %v1204_v26 = vrot.slane %v1203_v14, 4 }
 0x3b3   : > { %v1205_v27 = vadd.f32 %v1204_v26, %v1203_v14 }
 0x3b5   : > { %v1206_v28 = vrot.slane %v1205_v27, 2 }
 0x3b7   : > { %v1207_v29 = vadd.f32 %v1206_v28, %v1205_v27 }
 0x3b9   : > { %v1208_v30 = vrot.slane %v1207_v29, 1 }
 0x3bb   : > { %v1209_v31 = vadd.f32 %v1208_v30, %v1207_v29 }
 0x3bd   : > { %1613 = vpush %v1209_v31 }
 0x3d0   : > { %v1243_v32 = vpop.trf.xlu0 }
 0x3d1   : > { %v1259_v34 = vadd.f32 %v1243_v32, %v2311_v50  ;;  %v1297_v50 = vsel %vm279_vm10, %v1296_v4, 0.0 }
 0x3d3   : > { %v1263_v38 = vmul.f32 %v1259_v34, %v1259_v34 }
 0x3d4   : > { %v1244_v0 = vpop.trf.xlu0 }
 0x3d5   : > { %v1260_v35 = vadd.f32 %v1244_v0, %v1224_v56  ;;  %v1267_v43 = vsel %vm281_vm0, %v1263_v38, 0.0 }
 0x3d7   : > { %v1264_v36 = vmul.f32 %v1260_v35, %v1260_v35 }
 0x3d8   : > { %v1245_v37 = vpop.trf.xlu0 }
 0x3d9   : > { %v1261_v39 = vadd.f32 %v1245_v37, %v1225_v61  ;;  %v1268_v40 = vsel %vm281_vm0, %v1264_v36, 0.0 }
 0x3da   : > { %v1269_v45 = vadd.f32 %v1268_v40, %v1267_v43 }
 0x3db   : > { %v1265_v41 = vmul.f32 %v1261_v39, %v1261_v39 }
 0x3dc   : > { %v1246_v42 = vpop.trf.xlu0 }
 0x3dd   : > { %v1270_v44 = vsel %vm281_vm0, %v1265_v41, 0.0  ;;  %v1262_v2 = vadd.f32 %v1246_v42, %v1226_v8 }
 0x3de   : > { %v1271_v47 = vadd.f32 %v1270_v44, %v1269_v45 }
 0x3df   : > { %v1266_v46 = vmul.f32 %v1262_v2, %v1262_v2 }
 0x3e1   : > { %v1272_v48 = vsel %vm281_vm0, %v1266_v46, 0.0 }
 0x3e2   : > { %v1273_v49 = vadd.f32 %v1272_v48, %v1271_v47 }
 0x3e4   : > { %1274 = vadd.xlane.f32.xlu1 %v1273_v49 }
 0x3e8   : > { %1298 = vadd.xlane.f32.xlu1 %v1297_v50 }
 0x3ee   : > { %s1614_s30 = spop %1613 }
 0x3ef   : > { %s1211_s6 = sadd.f32 %s1614_s30, %s1612_s8  ;;  %s1514_s8 = sshll.u32 %s1915_s28, 4 }
 0x3f0   : > { %s1354_s28 = scalar_lea.sflag [#allocation13], %s2150_s17 }
 0x3f1   : > { %s1212_s18 = smul.f32 0.5, %s1211_s6  ;;  %s258_s6 = scalar_lea.vmem [#allocation17], %s2150_s17 }
 0x3f3   : > { %s1213_s16 = smax.f32 %s1934_s10, %s1212_s18  ;;  %s1366_s18 = sshll.u32 %s258_s6, 4  ;;  %s2351_s18 = int_to_ptr.vmem [resolvable:$true] %s1366_s18 }
 0x3f4   : > { %v1214_v51 = vstv %s1213_s16 }
 0x3f5   : > { %1725 = vrsqrt.f32 %v1214_v51  ;;  %vm1217_vm15 = vcmp.eq.f32.partialorder %v1214_v51, inf  ;;  %v1220_v20 = vand.u32 2147483648, %v1214_v51  ;;  %vm1219_vm0 = vcmp.eq.f32.partialorder %v1214_v51, 0.0 }
 0x3f6   : > { %1727 = vrsqrt.f32 %v1311_v9 }
 0x3ff   : > { %v1726_v52 = vpop.eup %1725 }
 0x400   : > { %v1216_v53 = vmul.f32 %v1726_v52, %v1214_v51 }
 0x402   : > { %v1218_v54 = vsel %vm1217_vm15, %v1214_v51, %v1216_v53 }
 0x403   : > { %v1221_v55 = vsel %vm1219_vm0, %v1220_v20, %v1218_v54 }
 0x404   : > { %1615 = vpush %v1221_v55 }
 0x435   : > { %s1616_s24 = spop %1615 }
 0x436   : > { %v1338_v56 = vstv %s1616_s24  ;;  %s2349_s24 = scalar_lea.hbm %s2402_s4, %s1514_s8 }
 0x437   : > { %v1339_v59 = vsel %vm1337_vm1, %v1338_v56, %v2301_v13  ;;  %v1728_v13 = vpop.eup %1727 }
 0x438   : > { %v1342_v60 = vsel %vm1340_vm2, %v1341_v58, %v1339_v59  ;;  %v1313_v17 = vmul.f32 %v1728_v13, %v1311_v9 }
 0x43a   : > { %v1315_v25 = vsel %vm1314_vm3, %v1311_v9, %v1313_v17 }
 0x43b   : > { %v1318_v27 = vsel %vm1316_vm6, %v1317_v23, %v1315_v25 }
 0x471   : > { %v1275_v61 = vpop.xlane.xlu1 %1274 }
 0x472   : > { %v1276_v62 = vrot.slane %v1275_v61, 4 }
 0x474   : > { %v1277_v63 = vadd.f32 %v1276_v62, %v1275_v61 }
 0x475   : > { %v1299_v8 = vpop.xlane.xlu1 %1298 }
 0x476   : > { %v1278_v3 = vrot.slane %v1277_v63, 2  ;;  %v1300_v11 = vrot.slane %v1299_v8, 4 }
 0x478   : > { %v1279_v5 = vadd.f32 %v1278_v3, %v1277_v63  ;;  %v1301_v12 = vadd.f32 %v1300_v11, %v1299_v8 }
 0x47a   : > { %v1280_v6 = vrot.slane %v1279_v5, 1  ;;  %v1302_v16 = vrot.slane %v1301_v12, 2 }
 0x47c   : > { %v1281_v7 = vadd.f32 %v1280_v6, %v1279_v5  ;;  %v1303_v33 = vadd.f32 %v1302_v16, %v1301_v12 }
 0x47e   : > { %1617 = vpush %v1281_v7  ;;  %v1304_v19 = vrot.slane %v1303_v33, 1 }
 0x480   : > { %v1305_v26 = vadd.f32 %v1304_v19, %v1303_v33 }
 0x4af   : > { %s1618_s12 = spop %1617 }
 0x4b0   : > { %v1283_v15 = vstv %s1618_s12  ;;  %s1936_s12 = smov [#allocation17]  }
 0x4b1   : > { %1729 = vrsqrt.f32 %v1283_v15  ;;  %vm1286_vm4 = vcmp.eq.f32.partialorder %v1283_v15, inf  ;;  %v1289_v22 = vand.u32 2147483648, %v1283_v15  ;;  %vm1288_vm5 = vcmp.eq.f32.partialorder %v1283_v15, 0.0 }
 0x4bb   : > { %v1730_v18 = vpop.eup %1729 }
 0x4bc   : > { %v1285_v21 = vmul.f32 %v1730_v18, %v1283_v15 }
 0x4be   : > { %v1287_v24 = vsel %vm1286_vm4, %v1283_v15, %v1285_v21 }
 0x4bf   : > { %v1290_v14 = vsel %vm1288_vm5, %v1289_v22, %v1287_v24 }
 0x4c0   : > { %1619 = vpush %v1290_v14 }
 0x4c1   : > { %1621 = vpush %v1305_v26 }
 0x4c2   : > { %1623 = vpush %v1318_v27 }
 0x4f1   : > { %s1620_s9 = spop %1619 }
 0x4f2   : > { %s1622_s14 = spop %1621  ;;  %s1292_s20 = smul.f32 0.5, %s1620_s9 }
 0x4f3   : > { %v1344_v28 = vstv %s1622_s14  ;;  %s1624_s19 = spop %1623  ;;  %s1835_s9 = sshll.u32 %s1936_s12, 4  ;;  %s1836_s9 = int_to_ptr.vmem [resolvable:$false] %s1835_s9 }
 0x4f4   : > { %v1345_v29 = vsel %vm1343_vm7, %v1344_v28, %v1342_v60  ;;  %s1320_s3 = smax.f32 %s1935_s21, %s1624_s19  ;;  %s1293_s5 = smul.f32 0.125, %s1292_s20 }
 0x4f5   : > { %v1321_v30 = vstv %s1320_s3  ;;  %s1837_s14 = scalar_lea.vmem %s1836_s9, 32  ;;  %p1838_p4 = scmp.lt.s32.totalorder %s2351_s18, %s1836_s9 }
 0x4f6   : > { %1731 = vrcp.f32 %v1321_v30  ;;  %v1350_v0 = vstv %s1293_s5 }
 0x500   : > { %v1732_v31 = vpop.eup %1731 }
 0x501   : > { %1625 = vpush %v1732_v31 }
 0x532   : > { %s1626_s23 = spop %1625 }
 0x533   : > { %s1324_s22 = smul.f32 %s1626_s23, %s2319_s13  ;;  %s1831_s13 = scalar_lea.vmem %s2351_s18, 16 }
 0x534   : > { %p1832_p1 = scmp.ne.s32.totalorder %s2351_s18, %s1831_s13  ;;  %p1839_p5 = scmp.lt.s32.totalorder %s1837_s14, %s1831_s13 }
 0x535   : > { %s1325_s30 = ssub.f32 1.0, %s1324_s22 }
 0x536   : > { %p1833_p8 = pnand %p1832_p1, %p2423_p3  ;;  %p1840_p10 = por %p1839_p5, %p1838_p4 }
 0x537   : > { %v1347_v32 = vstv %s1325_s30 }
 0x538   : > { %v1348_v34 = vsel %vm1346_vm8, %v1347_v32, %v1345_v29  ;;  %p1834_p12 = pneg %p1833_p8 }
 0x539   : > { %v1351_v35 = vsel %vm1349_vm9, %v1350_v0, %v1348_v34 }
 0x53a   : > { %1352 = vst [vmem:[%s258_s6] sm:$0x1] %v1351_v35  ;;  %p1841_p7 = pnand %p1840_p10, %p1834_p12 }
 0x53c   : > { %1844 = shalt.err (!%p1841_p7)
}
 0x53d   : > { %s1845_s17 = scalar_lea.hbm %s2349_s24, 16  ;;  %s1849_s3 = scalar_lea.hbm %s2402_s4, 32 }
 0x53e   : > { %p1846_p0 = scmp.ne.s32.totalorder %s2349_s24, %s1845_s17  ;;  %p1850_p6 = scmp.lt.u32.totalorder %s2349_s24, %s2402_s4 }
 0x53f   : > { %p1851_p13 = scmp.lt.u32.totalorder %s1849_s3, %s1845_s17  ;;  %p1853_p1 = scmp.lt.u32.totalorder %s1845_s17, %s2349_s24 }
 0x540   : > { %p1847_p11 = pnand %p1846_p0, %p2423_p3 }
 0x541   : > { %p1852_p2 = por %p1851_p13, %p1850_p6 }
 0x542   : > { %p1848_p9 = pneg %p1847_p11 }
 0x543   : > { %p1854_p8 = por %p1853_p1, %p1852_p2 }
 0x545   : > { %p1855_p12 = pnand %p1854_p8, %p1848_p9 }
 0x547   : > { %1858 = shalt.err (!%p1855_p12)
}
 0x548   : > { %1635 = dma.vmem_to_hbm [thread:$0]  (%p2423_p3), %s2351_s18, 16, %s2349_s24, %s1354_s28  }
 0x549 PF: > { %s1378_s22 = sand.u32 1, %s1903_s25   ;;  %p2424_p4 = scmp.ne.s32.totalorder %s2410_s7, 0 }
 0x54a   : > { %p2425_p5 = scmp.ge.s32.totalorder %s1923_s0, 2  ;;  %s1379_s5 = scalar_lea.sflag [#allocation13], %s1378_s22 }
 0x54c   : > { %p1649_p10 = pnand %p2425_p5, %p2424_p4 }
 0x54e   : > { %1898 = dma.done.wait (!%p1649_p10), %s1379_s5, 16  }
 0x54f   : > { %1900 = vsyncadd (!%p1649_p10), %s1379_s5, 4294967280  ;;  %s27_s0 = sadd.s32 1, %s1923_s0   ;;  %s2426_s11 = sld [smem:[#allocation23_spill]] }
 0x550   : > { %p24_p7 = scmp.ge.s32.totalorder %s27_s0, 4   ;;  %s2427_s25 = smov %s1907_s26 }
 0x551   : > { %s2428_s26 = smov %s1911_s27  ;;  %s2429_s27 = smov %s2077_s15 }
 0x552   : > { %s2430_s28 = smov %s1919_s29  ;;  %26 = sbr.rel (!%p24_p7) target bundleno = 20 (0x14), region = 117 }
 0x555   : > { %s2431_s29 = smov %s2426_s11 }
 0x559   :  { %1383 = vsyncpa [#allocation12], 1 }
 0x55a   :  { %1385 = vsyncpa [#allocation12 + $0x1], 1 }
 0x55b   :  { %1386 = vsyncpa [#allocation15], 1 }
 0x55c   :  { %1388 = vsyncpa [#allocation15 + $0x1], 1 }
 0x55d   :  { %1389 = vsyncpa [#allocation13], 1 }
 0x55e   :  { %1391 = vsyncpa [#allocation13 + $0x1], 1 }

</bundles_post_ra>
